<compile_context>
chip_gen: v6e
topology: v6e:2x2x1
jax: 0.10.0
libtpu: 0.0.40
codegen_flags: <defaults>
</compile_context>

<pallas_src>
import jax
import jax.numpy as jnp
from jax.experimental import pallas as pl
from jax.experimental.pallas import tpu as pltpu


# ------------------------ kernel 1: conv via im2col ------------------------- #

def _conv_kernel(patches_ref, w2_ref, v1_ref):
    """patches: (N, C*K*K, HW); w2: (O, C*K*K) pre-scaled by 0.5; v1: (N, O, HW)."""
    n_batch = patches_ref.shape[0]
    for i in range(n_batch):                       # N is tiny -> static unroll
        v1_ref[i] = jnp.dot(w2_ref[...], patches_ref[i],
                            preferred_element_type=jnp.float32)


# --------------------- kernel 2: fused addmm over mat1 ---------------------- #

def _addmm_kernel(u_ref, inp2_ref, mat1_ref, out_ref):
    """out = 0.5*inp2 + u @ mat1 for one lane-dense column tile of mat1/out.

    u_ref    : (N, P)   resident across the grid (u = 0.5*v1_2d + mat2)
    inp2_ref : (N, TQ)  streamed with the output tile
    mat1_ref : (P, TQ)  streamed column tile (dominates HBM traffic)
    out_ref  : (N, TQ)
    """
    acc = jnp.dot(u_ref[...], mat1_ref[...], preferred_element_type=jnp.float32)
    out_ref[...] = (0.5 * inp2_ref[...] + acc).astype(out_ref.dtype)


# --------------------------------- wrapper ---------------------------------- #

def _im2col_patches(inp, k):
    """(N, C, H, W) -> (N, C*K*K, Hout*Wout); row index c*K*K + kh*K + kw matches
    PyTorch weight.reshape(O, C*K*K); spatial column s = i*Wout + j (NCHW order)."""
    n, c, h, w = inp.shape
    hout, wout = h - k + 1, w - k + 1
    cols = []
    for kh in range(k):
        for kw in range(k):
            cols.append(inp[:, :, kh:kh + hout, kw:kw + wout]
                        .reshape(n, c, 1, hout * wout))
    p = jnp.concatenate(cols, axis=2)                 # (N, C, K*K, HW)
    return p.reshape(n, c * k * k, hout * wout)


def _pick_q_tile(q_dim, p_dim, itemsize=4, vmem_budget=20 << 20, min_steps=4):
    """Largest multiple-of-128 column-tile width that (a) divides q_dim, (b) keeps
    the double-buffered mat1 tile within the VMEM budget, and (c) leaves at least
    `min_steps` grid steps (>= 2 steps per TensorCore on a 2-core v7x chip so the
    pipeline stays double-buffered under 'parallel' megacore sharding)."""
    divisors = [t for t in range(128, q_dim + 1, 128) if q_dim % t == 0]
    if not divisors:
        return q_dim                                   # odd width: single full tile
    fits = [t for t in divisors if 2 * p_dim * t * itemsize <= vmem_budget]
    fits = fits or [divisors[0]]
    preferred = [t for t in fits if q_dim // t >= min_steps]
    return max(preferred) if preferred else min(fits)


def weighted_cat_forward(inp, mat1, mat2, conv_w):
    n, c, h, w = inp.shape
    out_ch, c_in, k, _ = conv_w.shape
    assert c_in == c
    hout, wout = h - k + 1, w - k + 1
    hw = hout * wout
    p_dim = out_ch * hw                      # flattened v1 features
    q_dim = c * h * w                        # flattened inp features
    assert mat1.shape == (p_dim, q_dim)
    assert mat2.shape == (n, p_dim)

    # ---- conv (already scaled by alpha=0.5) as a small resident Pallas kernel
    patches = _im2col_patches(inp, k)                   # (N, C*K*K, HW)
    ckk = c * k * k
    w2_half = conv_w.reshape(out_ch, ckk) * 0.5         # fold alpha into the weight

    v1_half = pl.pallas_call(
        _conv_kernel,
        out_shape=jax.ShapeDtypeStruct((n, out_ch, hw), jnp.float32),
        grid=(1,),
        in_specs=[pl.BlockSpec((n, ckk, hw), lambda i: (0, 0, 0)),
                  pl.BlockSpec((out_ch, ckk), lambda i: (0, 0))],
        out_specs=pl.BlockSpec((n, out_ch, hw), lambda i: (0, 0, 0)),
    )(patches, w2_half)

    # Tiny XLA glue on (N, P): NCHW flatten (o*HW + spatial) and fold in mat2.
    u = v1_half.reshape(n, p_dim) + mat2                # = 0.5*v1_2d + mat2
    inp2 = inp.reshape(n, q_dim)                        # PyTorch .reshape(N, -1)

    # ---- main kernel: out = 0.5*inp2 + u @ mat1, streamed lane-dense tiles ---
    q_tile = _pick_q_tile(q_dim, p_dim, itemsize=mat1.dtype.itemsize)
    grid = (q_dim // q_tile,)

    return pl.pallas_call(
        _addmm_kernel,
        out_shape=jax.ShapeDtypeStruct((n, q_dim), jnp.float32),
        grid=grid,
        in_specs=[
            pl.BlockSpec((n, p_dim), lambda j: (0, 0)),       # u (resident)
            pl.BlockSpec((n, q_tile), lambda j: (0, j)),      # 0.5*inp term
            pl.BlockSpec((p_dim, q_tile), lambda j: (0, j)),  # mat1 column tile
        ],
        out_specs=pl.BlockSpec((n, q_tile), lambda j: (0, j)),
        compiler_params=pltpu.CompilerParams(
            dimension_semantics=("parallel",),
            vmem_limit_bytes=32 * 1024 * 1024,
        ),
    )(u, inp2, mat1)
    # TODO(synk): for much larger P (bigger Hout*Wout / out_ch), add an 'arbitrary'
    #             P grid axis with an f32 scratch accumulator so the mat1 tile stays
    #             within v7x's 64 MiB VMEM; at these shapes full-P tiles are optimal.
    # TODO(synk): if bf16 storage of mat1 is acceptable, streaming it as bf16 with
    #             f32 accumulation halves the dominant HBM traffic (~2x end-to-end).


# ------------------------------- reference ---------------------------------- #

def _reference(inp, mat1, mat2, conv_w):
    """Pure-JAX (high-precision) reference for self-check."""
    n = inp.shape[0]
    hi = jax.lax.Precision.HIGHEST
    v1 = jax.lax.conv_general_dilated(
        inp, conv_w, window_strides=(1, 1), padding="VALID",
        dimension_numbers=("NCHW", "OIHW", "NCHW"), precision=hi)
    v1_2d = v1.reshape(n, -1)
    inp_2d = inp.reshape(n, -1)
    v2 = 0.5 * inp_2d + 0.5 * jnp.dot(v1_2d, mat1, precision=hi)
    return v2 + jnp.dot(mat2, mat1, precision=hi)


# ---------------------------------- main ------------------------------------ #

if __name__ == "__main__":
    key = jax.random.PRNGKey(0)
    N, C, H, W = 2, 4, 16, 16        # NCHW input
    OUT_CH, K = 8, 3                 # Conv2d(in_ch=4, out_ch=8, kernel_size=3)
    HOUT, WOUT = H - K + 1, W - K + 1
    P = OUT_CH * HOUT * WOUT         # 1568  (flattened v1 features)
    Q = C * H * W                    # 1024  (flattened inp features)

    k1, k2, k3, k4 = jax.random.split(key, 4)
    inp = jax.random.normal(k1, (N, C, H, W), jnp.float32)
    conv_w = jax.random.normal(k2, (OUT_CH, C, K, K), jnp.float32) / float(
        (C * K * K) ** 0.5)
    mat1 = jax.random.normal(k3, (P, Q), jnp.float32) * 0.1
    mat2 = jax.random.normal(k4, (N, P), jnp.float32) * 0.1

    fwd = jax.jit(weighted_cat_forward)
    out = fwd(inp, mat1, mat2, conv_w)
    jax.block_until_ready(out)

    ref = _reference(inp, mat1, mat2, conv_w)
    assert out.shape == (N, Q)
    # tolerance covers MXU f32-matmul pass-decomposition differences vs XLA HIGHEST
    assert jnp.allclose(out, ref, rtol=1e-2, atol=1e-2), "mismatch vs reference"

    print("KERNEL_OK")
</pallas_src>

<mosaic_0001>
module attributes {stable_mosaic.version = 11 : i64} {
  func.func @_conv_kernel(%arg0: i32, %arg1: memref<2x36x196xf32, #tpu.memory_space<vmem>>, %arg2: memref<8x36xf32, #tpu.memory_space<vmem>>, %arg3: memref<2x8x196xf32, #tpu.memory_space<vmem>>) attributes {dimension_semantics = [#tpu.dimension_semantics<arbitrary>], iteration_bounds = array<i64: 1>, scalar_prefetch = 0 : i64, scratch_operands = 0 : i64, tpu.core_type = #tpu.core_type<tc>, window_params = [{pipeline_mode = #tpu.pipeline_mode<synchronous>, transform_indices = @transform_0, window_bounds = array<i64: 2, 36, 196>}, {pipeline_mode = #tpu.pipeline_mode<synchronous>, transform_indices = @transform_1, window_bounds = array<i64: 8, 36>}, {pipeline_mode = #tpu.pipeline_mode<synchronous>, transform_indices = @transform_2, window_bounds = array<i64: 2, 8, 196>}]} {
    %c0 = arith.constant 0 : index
    %c0_0 = arith.constant 0 : index
    %0 = vector.load %arg2[%c0, %c0_0] : memref<8x36xf32, #tpu.memory_space<vmem>>, vector<8x36xf32>
    %c0_1 = arith.constant 0 : index
    %c0_2 = arith.constant 0 : index
    %c0_3 = arith.constant 0 : index
    %1 = vector.load %arg1[%c0_1, %c0_2, %c0_3] : memref<2x36x196xf32, #tpu.memory_space<vmem>>, vector<1x36x196xf32>
    %2 = vector.shape_cast %1 : vector<1x36x196xf32> to vector<36x196xf32>
    %cst = arith.constant dense<0.000000e+00> : vector<8x196xf32>
    %3 = tpu.matmul %0, %2, %cst {dimension_numbers = #tpu.dot_dimension_numbers<[1], [0], [0], [1], [0, 0, 1, 1], [], []>} : vector<8x36xf32>, vector<36x196xf32>, vector<8x196xf32> -> vector<8x196xf32>
    %c0_4 = arith.constant 0 : index
    %c0_5 = arith.constant 0 : index
    %c0_6 = arith.constant 0 : index
    %4 = vector.load %arg3[%c0_4, %c0_5, %c0_6] : memref<2x8x196xf32, #tpu.memory_space<vmem>>, vector<1x8x196xf32>
    %5 = vector.shape_cast %4 : vector<1x8x196xf32> to vector<8x196xf32>
    %6 = vector.shape_cast %3 : vector<8x196xf32> to vector<1x8x196xf32>
    tpu.vector_store %arg3[%c0_4, %c0_5, %c0_6], %6 {strides = array<i32>} : memref<2x8x196xf32, #tpu.memory_space<vmem>>, vector<1x8x196xf32>,
    %c0_7 = arith.constant 0 : index
    %c0_8 = arith.constant 0 : index
    %7 = vector.load %arg2[%c0_7, %c0_8] : memref<8x36xf32, #tpu.memory_space<vmem>>, vector<8x36xf32>
    %c1 = arith.constant 1 : index
    %c0_9 = arith.constant 0 : index
    %c0_10 = arith.constant 0 : index
    %8 = vector.load %arg1[%c1, %c0_9, %c0_10] : memref<2x36x196xf32, #tpu.memory_space<vmem>>, vector<1x36x196xf32>
    %9 = vector.shape_cast %8 : vector<1x36x196xf32> to vector<36x196xf32>
    %cst_11 = arith.constant dense<0.000000e+00> : vector<8x196xf32>
    %10 = tpu.matmul %7, %9, %cst_11 {dimension_numbers = #tpu.dot_dimension_numbers<[1], [0], [0], [1], [0, 0, 1, 1], [], []>} : vector<8x36xf32>, vector<36x196xf32>, vector<8x196xf32> -> vector<8x196xf32>
    %c1_12 = arith.constant 1 : index
    %c0_13 = arith.constant 0 : index
    %c0_14 = arith.constant 0 : index
    %11 = vector.load %arg3[%c1_12, %c0_13, %c0_14] : memref<2x8x196xf32, #tpu.memory_space<vmem>>, vector<1x8x196xf32>
    %12 = vector.shape_cast %11 : vector<1x8x196xf32> to vector<8x196xf32>
    %13 = vector.shape_cast %10 : vector<8x196xf32> to vector<1x8x196xf32>
    tpu.vector_store %arg3[%c1_12, %c0_13, %c0_14], %13 {strides = array<i32>} : memref<2x8x196xf32, #tpu.memory_space<vmem>>, vector<1x8x196xf32>,
    return
  }
  func.func @transform_0(%arg0: i32) -> (i32, i32, i32) {
    %c0_i32 = arith.constant 0 : i32
    %c0_i32_0 = arith.constant 0 : i32
    %c0_i32_1 = arith.constant 0 : i32
    %c0_i32_2 = arith.constant 0 : i32
    return %c0_i32, %c0_i32_0, %c0_i32_1 : i32, i32, i32
  }
  func.func @transform_1(%arg0: i32) -> (i32, i32) {
    %c0_i32 = arith.constant 0 : i32
    %c0_i32_0 = arith.constant 0 : i32
    %c0_i32_1 = arith.constant 0 : i32
    return %c0_i32, %c0_i32_0 : i32, i32
  }
  func.func @transform_2(%arg0: i32) -> (i32, i32, i32) {
    %c0_i32 = arith.constant 0 : i32
    %c0_i32_0 = arith.constant 0 : i32
    %c0_i32_1 = arith.constant 0 : i32
    %c0_i32_2 = arith.constant 0 : i32
    return %c0_i32, %c0_i32_0, %c0_i32_1 : i32, i32, i32
  }
}

module attributes {stable_mosaic.version = 11 : i64} {
  func.func @_addmm_kernel(%arg0: i32, %arg1: memref<2x1568xf32, #tpu.memory_space<vmem>>, %arg2: memref<2x256xf32, #tpu.memory_space<vmem>>, %arg3: memref<1568x256xf32, #tpu.memory_space<vmem>>, %arg4: memref<2x256xf32, #tpu.memory_space<vmem>>) attributes {dimension_semantics = [#tpu.dimension_semantics<parallel>], iteration_bounds = array<i64: 4>, scalar_prefetch = 0 : i64, scratch_operands = 0 : i64, tpu.core_type = #tpu.core_type<tc>, window_params = [{pipeline_mode = #tpu.pipeline_mode<synchronous>, transform_indices = @transform_0, window_bounds = array<i64: 2, 1568>}, {transform_indices = @transform_1, window_bounds = array<i64: 2, 256>}, {transform_indices = @transform_2, window_bounds = array<i64: 1568, 256>}, {transform_indices = @transform_3, window_bounds = array<i64: 2, 256>}]} {
    %c0 = arith.constant 0 : index
    %c0_0 = arith.constant 0 : index
    %0 = vector.load %arg1[%c0, %c0_0] : memref<2x1568xf32, #tpu.memory_space<vmem>>, vector<2x1568xf32>
    %c0_1 = arith.constant 0 : index
    %c0_2 = arith.constant 0 : index
    %1 = vector.load %arg3[%c0_1, %c0_2] : memref<1568x256xf32, #tpu.memory_space<vmem>>, vector<1568x256xf32>
    %cst = arith.constant dense<0.000000e+00> : vector<2x256xf32>
    %2 = tpu.matmul %0, %1, %cst {dimension_numbers = #tpu.dot_dimension_numbers<[1], [0], [0], [1], [0, 0, 1, 1], [], []>} : vector<2x1568xf32>, vector<1568x256xf32>, vector<2x256xf32> -> vector<2x256xf32>
    %c0_3 = arith.constant 0 : index
    %c0_4 = arith.constant 0 : index
    %3 = vector.load %arg2[%c0_3, %c0_4] : memref<2x256xf32, #tpu.memory_space<vmem>>, vector<2x256xf32>
    %cst_5 = arith.constant 5.000000e-01 : f32
    %4 = vector.broadcast %cst_5 : f32 to vector<2x256xf32>
    %5 = arith.mulf %4, %3 : vector<2x256xf32>
    %6 = arith.addf %5, %2 : vector<2x256xf32>
    %c0_6 = arith.constant 0 : index
    %c0_7 = arith.constant 0 : index
    %7 = vector.load %arg4[%c0_6, %c0_7] : memref<2x256xf32, #tpu.memory_space<vmem>>, vector<2x256xf32>
    tpu.vector_store %arg4[%c0_6, %c0_7], %6 {strides = array<i32>} : memref<2x256xf32, #tpu.memory_space<vmem>>, vector<2x256xf32>,
    return
  }
  func.func @transform_0(%arg0: i32) -> (i32, i32) {
    %c0_i32 = arith.constant 0 : i32
    %c0_i32_0 = arith.constant 0 : i32
    %c0_i32_1 = arith.constant 0 : i32
    return %c0_i32, %c0_i32_0 : i32, i32
  }
  func.func @transform_1(%arg0: i32) -> (i32, i32) {
    %c0_i32 = arith.constant 0 : i32
    %c0_i32_0 = arith.constant 0 : i32
    return %c0_i32, %arg0 : i32, i32
  }
  func.func @transform_2(%arg0: i32) -> (i32, i32) {
    %c0_i32 = arith.constant 0 : i32
    %c0_i32_0 = arith.constant 0 : i32
    return %c0_i32, %arg0 : i32, i32
  }
  func.func @transform_3(%arg0: i32) -> (i32, i32) {
    %c0_i32 = arith.constant 0 : i32
    %c0_i32_0 = arith.constant 0 : i32
    return %c0_i32, %arg0 : i32, i32
  }
}

</mosaic_0001>

<bundles_post_ra>
// kernel: weighted_cat_forward.2
= control target key start
LH: loop header
LB: loop body
LE: loop exit
PB: predicated region body
PF: predicated region fallthrough
CT: control target
= control target key end

     0   :  { %vm26_vm0 = vcmask 1043456   ;;  %v225_v3 = vmov 0.0   ;;  %vm22_vm1 = vcmask 293888   ;;  %vm105_vm2 = vcmask 556032   ;;  %s316_s0 = inlined_call_operand.vmem [shape: f32[2,36,196], index: 0, kind: input, shape index: {}]   ;;  %s317_s1 = inlined_call_operand.vmem [shape: f32[8,36], index: 1, kind: input, shape index: {}]   ;;  %s318_s2 = inlined_call_operand.vmem [shape: f32[2,8,196], index: 2, kind: output, shape index: {}]  }
   0x1   :  { %v21_v0 = vld [vmem:[%s316_s0 + $0x48] sm:$0xf]  ;;  %v218_v1 = vld [vmem:[%s316_s0 + $0x98] sm:$0xf]  ;;  %v20_v2 = vld [vmem:[%s316_s0 + $0x40] sm:$0xf]  ;;  %97 = vmatprep.mubr.f32.mxu0 %v225_v3  ;;  %192 = vmatprep.mubr.f32.mxu1 %v225_v3 }
   0x2   :  { %206 = vmatprep.subr.msk.mxu0 %vm26_vm0, %v21_v0  ;;  %219 = vmatprep.subr.msk.mxu1 %vm26_vm0, %v218_v1  ;;  %v217_v4 = vld [vmem:[%s316_s0 + $0x90] sm:$0xf]  ;;  %v19_v5 = vld [vmem:[%s316_s0 + $0x38] sm:$0xff]  ;;  %v216_v6 = vld [vmem:[%s316_s0 + $0x88] sm:$0xff] }
   0x3   :  { %207 = vmatpush1.msk.msra.mxu0 %vm26_vm0, %v20_v2  ;;  %220 = vmatpush1.msk.msra.mxu1 %vm26_vm0, %v217_v4  ;;  %v18_v7 = vld [vmem:[%s316_s0 + $0x30] sm:$0xff]  ;;  %v215_v8 = vld [vmem:[%s316_s0 + $0x80] sm:$0xff]  ;;  %v17_v9 = vld [vmem:[%s316_s0 + $0x28] sm:$0xff] }
   0x4   :  { %57 = vmatprep.subr.mxu0 %v19_v5  ;;  %152 = vmatprep.subr.mxu1 %v216_v6  ;;  %v214_v10 = vld [vmem:[%s316_s0 + $0x78] sm:$0xff]  ;;  %v16_v11 = vld [vmem:[%s316_s0 + $0x20] sm:$0xff]  ;;  %v213_v12 = vld [vmem:[%s316_s0 + $0x70] sm:$0xff] }
   0x5   :  { %58 = vmatpush1.msra.mxu0 %v18_v7  ;;  %153 = vmatpush1.msra.mxu1 %v215_v8  ;;  %v15_v13 = vld [vmem:[%s316_s0 + $0x18] sm:$0xff]  ;;  %v212_v14 = vld [vmem:[%s316_s0 + $0x68] sm:$0xff]  ;;  %v14_v15 = vld [vmem:[%s316_s0 + $0x10] sm:$0xff] }
   0x6   :  { %59 = vmatprep.subr.mxu0 %v17_v9  ;;  %154 = vmatprep.subr.mxu1 %v214_v10  ;;  %v211_v16 = vld [vmem:[%s316_s0 + $0x60] sm:$0xff]  ;;  %v13_v17 = vld [vmem:[%s316_s0 + $0x8] sm:$0xff]  ;;  %v210_v18 = vld [vmem:[%s316_s0 + $0x58] sm:$0xff] }
   0x7   :  { %60 = vmatpush1.msra.mxu0 %v16_v11  ;;  %155 = vmatpush1.msra.mxu1 %v213_v12  ;;  %v12_v19 = vld [vmem:[%s316_s0] sm:$0xff]  ;;  %v209_v20 = vld [vmem:[%s316_s0 + $0x50] sm:$0xff] }
   0x8   :  { %61 = vmatprep.subr.mxu0 %v15_v13  ;;  %156 = vmatprep.subr.mxu1 %v212_v14  ;;  %v11_v21 = vld [vmem:[%s317_s1] sm:$0xff] }
   0x9   :  { %62 = vmatpush1.msra.mxu0 %v14_v15  ;;  %157 = vmatpush1.msra.mxu1 %v211_v16 }
   0xa   :  { %63 = vmatprep.subr.mxu0 %v13_v17  ;;  %158 = vmatprep.subr.mxu1 %v210_v18 }
   0xb   :  { %64 = vmatpush1.msra.mxu0 %v12_v19  ;;  %159 = vmatpush1.msra.mxu1 %v209_v20 }
   0xc   :  { %208 = vmatmul.mubr.msk.f32.vlgmr.msra.gmra.mxu0 %vm22_vm1, %v11_v21  ;;  %221 = vmatmul.mubr.msk.f32.vlgmr.msra.gmra.mxu1 %vm22_vm1, %v11_v21 }
  0xcc   :  { %v99_v22 = vpop.f32.mrf.mxu0  ;;  %v194_v23 = vpop.f32.mrf.mxu1 }
  0xcd   :  { %104 = vst [vmem:[%s318_s2] sm:$0xff] %v99_v22  ;;  %222 = vst [vmem:[%s318_s2 + $0x10] sm:$0xff] %v194_v23 }
  0xce   :  { %v101_v24 = vpop.f32.mrf.mxu0  ;;  %v196_v25 = vpop.f32.mrf.mxu1 }
  0xcf   :  { %106 = vst.msk [vmem:[%s318_s2 + $0x8] sm:$0xff] %vm105_vm2, %v101_v24  ;;  %223 = vst.msk [vmem:[%s318_s2 + $0x18] sm:$0xff] %vm105_vm2, %v196_v25 }

// kernel: weighted_cat_forward.3
= control target key start
LH: loop header
LB: loop body
LE: loop exit
PB: predicated region body
PF: predicated region fallthrough
CT: control target
= control target key end

     0   :  { %8 = vsyncpa [#allocation3], 0  ;;  %s2044_s0 = inlined_call_operand.vmem [shape: f32[2,1568], index: 0, kind: input, shape index: {}]   ;;  %s2045_s1 = inlined_call_operand.vmem [shape: f32[2,1024], index: 1, kind: input, shape index: {}]   ;;  %s2046_s2 = inlined_call_operand.hbm [shape: f32[1568,1024], index: 2, kind: input, shape index: {}]   ;;  %s2047_s3 = inlined_call_operand.hbm [shape: f32[2,1024], index: 3, kind: output, shape index: {}]  }
   0x1   :  { %10 = vsyncpa [#allocation3 + $0x1], 0 }
   0x2   :  { %11 = vsyncpa [#allocation4], 0 }
   0x3   :  { %13 = vsyncpa [#allocation4 + $0x1], 0  ;;  %s1490_s12 = smov 0   ;;  %s1492_s13 = smov 0  }
   0x4   :  { %s1494_s14 = smov 0   ;;  %s1496_s15 = smov 0  }
   0x5 LB: > { %s1511_s16 = sadd.s32 4294967295, %s1461_s15   ;;  %s1295_s17 = sadd.s32 4294967294, %s1461_s15   ;;  %s1461_s15 = sphi %s1496_s15, %s2061_s15   ;;  %s1457_s14 = sphi %s1494_s14, %s2060_s14   ;;  %s1453_s13 = sphi %s1492_s13, %s2059_s13   ;;  %s1449_s12 = sphi %s1490_s12, %s2058_s12  }
   0x6   : > { %s1515_s18 = sadd.s32 1, %s1461_s15   ;;  %s73_s19 = sadd.s32 1, %s1457_s14 }
   0x7   : > { %s70_s20 = ssub.s32 %s1461_s15, %s1515_s18  ;;  %p80_p0 = scmp.ne.s32.totalorder %s1457_s14, %s1453_s13 }
   0x8   : > { %p71_p1 = scmp.eq.s32.totalorder %s70_s20, 0  ;;  %p81_p2 = scmp.eq.s32.totalorder %s1461_s15, 0 }
   0x9   : > { %p86_p3 = scmp.ne.s32.totalorder %s1453_s13, %s1449_s12  ;;  %p87_p4 = scmp.eq.s32.totalorder %s1511_s16, 0 }
   0xa   : > { %s1527_s21 = scalar_select %p71_p1, %s1457_s14, %s73_s19  }
   0xb   : > { %p82_p5 = por %p81_p2, %p80_p0  ;;  %p1529_p6 = por %p87_p4, %p86_p3 }
   0xc   : > { %p110_p7 = scmp.eq.s32.totalorder %s1511_s16, 3  ;;  %p116_p8 = scmp.eq.s32.totalorder %s1295_s17, 3 }
   0xd   : > { %s2050_s22 = scalar_select %p1529_p6, 1, 0 }
   0xe   : > { %p1327_p9 = scmp.lt.s32.totalorder %s1461_s15, 4  ;;  %p1535_p10 = por %p110_p7, %p80_p0 }
   0xf   : > { %p1539_p11 = por %p116_p8, %p86_p3  ;;  %s148_s25 = sand.u32 1, %s1457_s14  }
  0x10   : > { %s2051_s23 = scalar_select %p1535_p10, 1, 0 }
  0x11   : > { %s2052_s24 = scalar_select %p1539_p11, 1, 0 }
  0x12   : > { %s1311_s26 = sshll.u32 %s1461_s15, 8  ;;  %s1313_s27 = smul.u32 3136, %s148_s25 }
  0x13   : > { %s1548_s30 = scalar_lea.hbm %s2046_s2, %s1311_s26  ;;  %p1550_p12 = pnand %p1327_p9, %p82_p5 }
  0x14   : > { %s152_s5 = scalar_lea.vmem [#allocation2], %s1313_s27  ;;  %s1557_s7 = scalar_lea.sflag [#allocation3], %s148_s25 }
  0x15   : > { %s159_s6 = sshll.u32 %s152_s5, 4  ;;  %s1369_s8 = scalar_lea.hbm %s1548_s30, 50176  ;;  %s1554_s6 = int_to_ptr.vmem [resolvable:$true] %s159_s6 }
  0x16   : > { %p1370_p0 = scmp.ne.s32.totalorder %s1548_s30, %s1369_s8  ;;  %p1371_p1 = pneg %p1550_p12 }
  0x17   : > { %s1374_s11 = scalar_lea.hbm %s2046_s2, 200704  ;;  %p1375_p4 = scmp.lt.s32.totalorder %s1548_s30, %s2046_s2 }
  0x18   : > { %p1372_p2 = pnand %p1371_p1, %p1370_p0  ;;  %p1376_p5 = scmp.lt.s32.totalorder %s1374_s11, %s1369_s8 }
  0x1a   : > { %p1373_p3 = pneg %p1372_p2  ;;  %p1377_p7 = por %p1376_p5, %p1375_p4 }
  0x1c   : > { %p1378_p8 = pnand %p1377_p7, %p1373_p3 }
  0x1e   : > { %1381 = shalt.err (!%p1378_p8)
}
  0x1f   : > { %s1382_s20 = scalar_lea.vmem %s1554_s6, 50176  ;;  %s1463_s25 = smov [#allocation2]  }
  0x20   : > { %p1383_p9 = scmp.ne.s32.totalorder %s1554_s6, %s1382_s20  ;;  %s1387_s26 = sshll.u32 %s1463_s25, 4  ;;  %s1388_s26 = int_to_ptr.vmem [resolvable:$false] %s1387_s26 }
  0x21   : > { %s1389_s27 = scalar_lea.vmem %s1388_s26, 100352  ;;  %p1390_p2 = scmp.lt.s32.totalorder %s1554_s6, %s1388_s26 }
  0x22   : > { %p1385_p13 = pnand %p1383_p9, %p1371_p1  ;;  %p1391_p11 = scmp.lt.s32.totalorder %s1389_s27, %s1382_s20 }
  0x24   : > { %p1386_p0 = pneg %p1385_p13  ;;  %p1392_p10 = por %p1391_p11, %p1390_p2 }
  0x26   : > { %p1393_p6 = pnand %p1392_p10, %p1386_p0 }
  0x28   : > { %1396 = shalt.err (!%p1393_p6)
}
  0x29   : > { %s1464_s28 = smov 1024   ;;  %s1465_s29 = smov 256  }
  0x2a   : > { %s1466_s5 = smov 16   ;;  %p167_p13 = scmp.lt.s32.totalorder %s1461_s15, 5 }
  0x2b   : > { %1322 = dma.hbm_to_vmem [thread:$0]  (!%p1550_p12), %s1548_s30, 50176, %s1554_s6, %s1557_s7, %s1464_s28, %s1465_s29, %s1466_s5  }
  0x2c   : > { %p2054_p1 = scmp.ge.s32.totalorder %s1461_s15, 1 }
  0x2e   : > { %p168_p3 = pnand %p2054_p1, %p167_p13 }
  0x2f   : > { %s1582_s8 = sand.u32 (!%p168_p3), 1, %s1453_s13   ;;  %p2055_p6 = scmp.ne.s32.totalorder (!%p168_p3), %s2050_s22, 0 }
  0x30   : > { %171 = sbr.rel (%p168_p3) target bundleno = 476 (0x1dc), region = 32  ;;  %s174_s10 = scalar_lea.sflag (!%p168_p3), [#allocation3], %s1582_s8 }
  0x31   : > { %s1314_s9 = smul.u32 (!%p168_p3), 3136, %s1582_s8 }
  0x33   : > { %s1586_s11 = scalar_lea.vmem (!%p168_p3), [#allocation2], %s1314_s9 }
  0x35   : > { %1440 = dma.done.wait (%p2055_p6), %s174_s10, 50176  }
  0x36   : > { %1442 = vsyncadd (%p2055_p6), %s174_s10, 4294917120  ;;  %v248_v0 = vld [vmem:[%s1586_s11 + $0xf8] sm:$0xff]  ;;  %v247_v2 = vld [vmem:[%s1586_s11 + $0xf0] sm:$0xff]  ;;  %vm683_vm0 = vcmask 261120   ;;  %s1302_s25 = sshll.u32 %s1511_s16, 1  ;;  %s1301_s5 = sshll.u32 %s1582_s8, 2 }
  0x37   : > { %v312_v1 = vld [vmem:[%s1586_s11 + $0x2f8] sm:$0xff]  ;;  %686 = vmatprep.subr.mxu0 %v248_v0  ;;  %v311_v3 = vld [vmem:[%s1586_s11 + $0x2f0] sm:$0xff]  ;;  %v246_v4 = vld [vmem:[%s1586_s11 + $0xe8] sm:$0xff]  ;;  %p206_p10 = scmp.lt.s32.totalorder %s1302_s25, 7  ;;  %s1312_s9 = sshll.u32 %s1511_s16, 6 }
  0x38   : > { %757 = vmatprep.subr.mxu1 %v312_v1  ;;  %v310_v5 = vld [vmem:[%s1586_s11 + $0x2e8] sm:$0xff]  ;;  %687 = vmatpush1.msra.mxu0 %v247_v2  ;;  %v245_v6 = vld [vmem:[%s1586_s11 + $0xe0] sm:$0xff]  ;;  %v244_v8 = vld [vmem:[%s1586_s11 + $0xd8] sm:$0xff]  ;;  %s204_s10 = scalar_lea.vmem [#allocation5], %s1301_s5  ;;  %s1211_s4 = scalar_lea.hbm %s2047_s3, %s1312_s9 }
  0x39   : > { %758 = vmatpush1.msra.mxu1 %v311_v3  ;;  %v309_v7 = vld [vmem:[%s1586_s11 + $0x2e0] sm:$0xff]  ;;  %688 = vmatprep.subr.mxu0 %v246_v4  ;;  %v308_v9 = vld [vmem:[%s1586_s11 + $0x2d8] sm:$0xff]  ;;  %v243_v10 = vld [vmem:[%s1586_s11 + $0xd0] sm:$0xff]  ;;  %s2063_s25 = smov (!%p206_p10, %s1302_s25), 7  ;;  %s1199_s6 = scalar_lea.sflag [#allocation4], %s1582_s8 }
  0x3a   : > { %759 = vmatprep.subr.mxu1 %v310_v5  ;;  %v307_v11 = vld [vmem:[%s1586_s11 + $0x2d0] sm:$0xff]  ;;  %689 = vmatpush1.msra.mxu0 %v245_v6  ;;  %v242_v12 = vld [vmem:[%s1586_s11 + $0xc8] sm:$0xff]  ;;  %v241_v14 = vld [vmem:[%s1586_s11 + $0xc0] sm:$0xff]  ;;  %s1303_s26 = sshll.u32 %s2063_s25, 1  ;;  %p2056_p12 = scmp.ne.s32.totalorder %s2051_s23, 0 }
  0x3b   : > { %760 = vmatpush1.msra.mxu1 %v309_v7  ;;  %v306_v13 = vld [vmem:[%s1586_s11 + $0x2c8] sm:$0xff]  ;;  %690 = vmatprep.subr.mxu0 %v244_v8  ;;  %v305_v15 = vld [vmem:[%s1586_s11 + $0x2c0] sm:$0xff]  ;;  %v240_v16 = vld [vmem:[%s1586_s11 + $0xb8] sm:$0xff]  ;;  %s209_s29 = scalar_lea.vmem %s2045_s1, %s1303_s26  ;;  %s1469_s17 = smov [#allocation5]  }
  0x3c   : > { %761 = vmatprep.subr.mxu1 %v308_v9  ;;  %691 = vmatpush1.msra.mxu0 %v243_v10  ;;  %v304_v17 = vld [vmem:[%s1586_s11 + $0x2b8] sm:$0xff]  ;;  %v239_v18 = vld [vmem:[%s1586_s11 + $0xb0] sm:$0xff]  ;;  %v238_v20 = vld [vmem:[%s1586_s11 + $0xa8] sm:$0xff]  ;;  %s1401_s19 = sshll.u32 %s1469_s17, 4  ;;  %s1402_s19 = int_to_ptr.vmem [resolvable:$false] %s1401_s19 }
  0x3d   : > { %762 = vmatpush1.msra.mxu1 %v307_v11  ;;  %692 = vmatprep.subr.mxu0 %v242_v12  ;;  %v303_v19 = vld [vmem:[%s1586_s11 + $0x2b0] sm:$0xff]  ;;  %v302_v21 = vld [vmem:[%s1586_s11 + $0x2a8] sm:$0xff]  ;;  %v237_v22 = vld [vmem:[%s1586_s11 + $0xa0] sm:$0xff]  ;;  %s1403_s16 = scalar_lea.vmem %s1402_s19, 128 }
  0x3e   : > { %763 = vmatprep.subr.mxu1 %v306_v13  ;;  %693 = vmatpush1.msra.mxu0 %v241_v14  ;;  %v301_v23 = vld [vmem:[%s1586_s11 + $0x2a0] sm:$0xff]  ;;  %v236_v24 = vld [vmem:[%s1586_s11 + $0x98] sm:$0xff]  ;;  %v235_v26 = vld [vmem:[%s1586_s11 + $0x90] sm:$0xff] }
  0x3f   : > { %764 = vmatpush1.msra.mxu1 %v305_v15  ;;  %694 = vmatprep.subr.mxu0 %v240_v16  ;;  %v300_v25 = vld [vmem:[%s1586_s11 + $0x298] sm:$0xff]  ;;  %v299_v27 = vld [vmem:[%s1586_s11 + $0x290] sm:$0xff]  ;;  %v234_v28 = vld [vmem:[%s1586_s11 + $0x88] sm:$0xff] }
  0x40   : > { %765 = vmatprep.subr.mxu1 %v304_v17  ;;  %695 = vmatpush1.msra.mxu0 %v239_v18  ;;  %v298_v29 = vld [vmem:[%s1586_s11 + $0x288] sm:$0xff]  ;;  %v233_v30 = vld [vmem:[%s1586_s11 + $0x80] sm:$0xff]  ;;  %v232_v32 = vld [vmem:[%s1586_s11 + $0x78] sm:$0xff] }
  0x41   : > { %766 = vmatpush1.msra.mxu1 %v303_v19  ;;  %696 = vmatprep.subr.mxu0 %v238_v20  ;;  %v297_v31 = vld [vmem:[%s1586_s11 + $0x280] sm:$0xff]  ;;  %v296_v33 = vld [vmem:[%s1586_s11 + $0x278] sm:$0xff]  ;;  %v231_v34 = vld [vmem:[%s1586_s11 + $0x70] sm:$0xff] }
  0x42   : > { %767 = vmatprep.subr.mxu1 %v302_v21  ;;  %697 = vmatpush1.msra.mxu0 %v237_v22  ;;  %v295_v35 = vld [vmem:[%s1586_s11 + $0x270] sm:$0xff]  ;;  %v230_v36 = vld [vmem:[%s1586_s11 + $0x68] sm:$0xff]  ;;  %v229_v38 = vld [vmem:[%s1586_s11 + $0x60] sm:$0xff] }
  0x43   : > { %768 = vmatpush1.msra.mxu1 %v301_v23  ;;  %698 = vmatprep.subr.mxu0 %v236_v24  ;;  %v294_v37 = vld [vmem:[%s1586_s11 + $0x268] sm:$0xff]  ;;  %v293_v39 = vld [vmem:[%s1586_s11 + $0x260] sm:$0xff]  ;;  %v228_v40 = vld [vmem:[%s1586_s11 + $0x58] sm:$0xff] }
  0x44   : > { %769 = vmatprep.subr.mxu1 %v300_v25  ;;  %699 = vmatpush1.msra.mxu0 %v235_v26  ;;  %v292_v41 = vld [vmem:[%s1586_s11 + $0x258] sm:$0xff]  ;;  %v227_v42 = vld [vmem:[%s1586_s11 + $0x50] sm:$0xff]  ;;  %v226_v44 = vld [vmem:[%s1586_s11 + $0x48] sm:$0xff] }
  0x45   : > { %770 = vmatpush1.msra.mxu1 %v299_v27  ;;  %700 = vmatprep.subr.mxu0 %v234_v28  ;;  %v291_v43 = vld [vmem:[%s1586_s11 + $0x250] sm:$0xff]  ;;  %v290_v45 = vld [vmem:[%s1586_s11 + $0x248] sm:$0xff]  ;;  %v225_v46 = vld [vmem:[%s1586_s11 + $0x40] sm:$0xff] }
  0x46   : > { %771 = vmatprep.subr.mxu1 %v298_v29  ;;  %701 = vmatpush1.msra.mxu0 %v233_v30  ;;  %v289_v47 = vld [vmem:[%s1586_s11 + $0x240] sm:$0xff]  ;;  %v224_v48 = vld [vmem:[%s1586_s11 + $0x38] sm:$0xff]  ;;  %v223_v50 = vld [vmem:[%s1586_s11 + $0x30] sm:$0xff]  ;;  %v1467_v30 = vmov 1983009808  }
  0x47   : > { %772 = vmatpush1.msra.mxu1 %v297_v31  ;;  %702 = vmatprep.subr.mxu0 %v232_v32  ;;  %v288_v49 = vld [vmem:[%s1586_s11 + $0x238] sm:$0xff]  ;;  %v287_v51 = vld [vmem:[%s1586_s11 + $0x230] sm:$0xff]  ;;  %v222_v52 = vld [vmem:[%s1586_s11 + $0x28] sm:$0xff]  ;;  %v615_v31 = vunpack.c.l.s4 %v1467_v30  ;;  %v617_v32 = vlaneseq }
  0x48   : > { %773 = vmatprep.subr.mxu1 %v296_v33  ;;  %703 = vmatpush1.msra.mxu0 %v231_v34  ;;  %v286_v53 = vld [vmem:[%s1586_s11 + $0x228] sm:$0xff]  ;;  %v221_v54 = vld [vmem:[%s1586_s11 + $0x20] sm:$0xff]  ;;  %v220_v56 = vld [vmem:[%s1586_s11 + $0x18] sm:$0xff] }
  0x49   : > { %774 = vmatpush1.msra.mxu1 %v295_v35  ;;  %704 = vmatprep.subr.mxu0 %v230_v36  ;;  %v285_v55 = vld [vmem:[%s1586_s11 + $0x220] sm:$0xff]  ;;  %v284_v57 = vld [vmem:[%s1586_s11 + $0x218] sm:$0xff]  ;;  %v219_v58 = vld [vmem:[%s1586_s11 + $0x10] sm:$0xff] }
  0x4a   : > { %775 = vmatprep.subr.mxu1 %v294_v37  ;;  %705 = vmatpush1.msra.mxu0 %v229_v38  ;;  %v283_v59 = vld [vmem:[%s1586_s11 + $0x210] sm:$0xff]  ;;  %v218_v60 = vld [vmem:[%s1586_s11 + $0x8] sm:$0xff]  ;;  %v217_v62 = vld [vmem:[%s1586_s11] sm:$0xff] }
  0x4b   : > { %776 = vmatpush1.msra.mxu1 %v293_v39  ;;  %706 = vmatprep.subr.mxu0 %v228_v40  ;;  %v282_v61 = vld [vmem:[%s1586_s11 + $0x208] sm:$0xff]  ;;  %v281_v63 = vld [vmem:[%s1586_s11 + $0x200] sm:$0xff]  ;;  %v280_v0 = vld [vmem:[%s1586_s11 + $0x1f8] sm:$0xff] }
  0x4c   : > { %777 = vmatprep.subr.mxu1 %v292_v41  ;;  %707 = vmatpush1.msra.mxu0 %v227_v42  ;;  %v344_v1 = vld [vmem:[%s1586_s11 + $0x3f8] sm:$0xff]  ;;  %v279_v2 = vld [vmem:[%s1586_s11 + $0x1f0] sm:$0xff]  ;;  %v278_v4 = vld [vmem:[%s1586_s11 + $0x1e8] sm:$0xff]  ;;  %v616_v41 = vunpack.c.0.s8 %v615_v31  ;;  %v618_v42 = vshrl.u32 %v617_v32, 7 }
  0x4d   : > { %778 = vmatpush1.msra.mxu1 %v291_v43  ;;  %708 = vmatprep.subr.mxu0 %v226_v44  ;;  %v343_v3 = vld [vmem:[%s1586_s11 + $0x3f0] sm:$0xff]  ;;  %v342_v5 = vld [vmem:[%s1586_s11 + $0x3e8] sm:$0xff]  ;;  %v277_v6 = vld [vmem:[%s1586_s11 + $0x1e0] sm:$0xff] }
  0x4e   : > { %779 = vmatprep.subr.mxu1 %v290_v45  ;;  %709 = vmatpush1.msra.mxu0 %v225_v46  ;;  %v341_v7 = vld [vmem:[%s1586_s11 + $0x3e0] sm:$0xff]  ;;  %v276_v8 = vld [vmem:[%s1586_s11 + $0x1d8] sm:$0xff]  ;;  %v275_v10 = vld [vmem:[%s1586_s11 + $0x1d0] sm:$0xff] }
  0x4f   : > { %780 = vmatpush1.msra.mxu1 %v289_v47  ;;  %710 = vmatprep.subr.mxu0 %v224_v48  ;;  %v340_v9 = vld [vmem:[%s1586_s11 + $0x3d8] sm:$0xff]  ;;  %v339_v11 = vld [vmem:[%s1586_s11 + $0x3d0] sm:$0xff]  ;;  %v274_v12 = vld [vmem:[%s1586_s11 + $0x1c8] sm:$0xff] }
  0x50   : > { %781 = vmatprep.subr.mxu1 %v288_v49  ;;  %711 = vmatpush1.msra.mxu0 %v223_v50  ;;  %v338_v13 = vld [vmem:[%s1586_s11 + $0x3c8] sm:$0xff]  ;;  %v273_v14 = vld [vmem:[%s1586_s11 + $0x1c0] sm:$0xff]  ;;  %v272_v16 = vld [vmem:[%s1586_s11 + $0x1b8] sm:$0xff] }
  0x51   : > { %782 = vmatpush1.msra.mxu1 %v287_v51  ;;  %712 = vmatprep.subr.mxu0 %v222_v52  ;;  %v337_v15 = vld [vmem:[%s1586_s11 + $0x3c0] sm:$0xff]  ;;  %v336_v17 = vld [vmem:[%s1586_s11 + $0x3b8] sm:$0xff]  ;;  %v271_v18 = vld [vmem:[%s1586_s11 + $0x1b0] sm:$0xff]  ;;  %v1705_v52 = vsub.s32 %v616_v41, %v618_v42 }
  0x52   : > { %783 = vmatprep.subr.mxu1 %v286_v53  ;;  %713 = vmatpush1.msra.mxu0 %v221_v54  ;;  %v335_v19 = vld [vmem:[%s1586_s11 + $0x3b0] sm:$0xff]  ;;  %v270_v20 = vld [vmem:[%s1586_s11 + $0x1a8] sm:$0xff]  ;;  %v269_v22 = vld [vmem:[%s1586_s11 + $0x1a0] sm:$0xff] }
  0x53   : > { %784 = vmatpush1.msra.mxu1 %v285_v55  ;;  %714 = vmatprep.subr.mxu0 %v220_v56  ;;  %v334_v21 = vld [vmem:[%s1586_s11 + $0x3a8] sm:$0xff]  ;;  %v333_v23 = vld [vmem:[%s1586_s11 + $0x3a0] sm:$0xff]  ;;  %v268_v24 = vld [vmem:[%s1586_s11 + $0x198] sm:$0xff] }
  0x54   : > { %785 = vmatprep.subr.mxu1 %v284_v57  ;;  %715 = vmatpush1.msra.mxu0 %v219_v58  ;;  %v332_v25 = vld [vmem:[%s1586_s11 + $0x398] sm:$0xff]  ;;  %v267_v26 = vld [vmem:[%s1586_s11 + $0x190] sm:$0xff]  ;;  %v266_v28 = vld [vmem:[%s1586_s11 + $0x188] sm:$0xff] }
  0x55   : > { %786 = vmatpush1.msra.mxu1 %v283_v59  ;;  %716 = vmatprep.subr.mxu0 %v218_v60  ;;  %v331_v27 = vld [vmem:[%s1586_s11 + $0x390] sm:$0xff]  ;;  %v330_v29 = vld [vmem:[%s1586_s11 + $0x388] sm:$0xff]  ;;  %v265_v33 = vld [vmem:[%s1586_s11 + $0x180] sm:$0xff] }
  0x56   : > { %787 = vmatprep.subr.mxu1 %v282_v61  ;;  %717 = vmatpush1.msra.mxu0 %v217_v62  ;;  %v329_v34 = vld [vmem:[%s1586_s11 + $0x380] sm:$0xff]  ;;  %v264_v35 = vld [vmem:[%s1586_s11 + $0x178] sm:$0xff]  ;;  %v263_v37 = vld [vmem:[%s1586_s11 + $0x170] sm:$0xff] }
  0x57   : > { %788 = vmatpush1.msra.mxu1 %v281_v63  ;;  %718 = vmatprep.subr.mxu0 %v280_v0  ;;  %v328_v36 = vld [vmem:[%s1586_s11 + $0x378] sm:$0xff]  ;;  %v327_v38 = vld [vmem:[%s1586_s11 + $0x370] sm:$0xff]  ;;  %v262_v39 = vld [vmem:[%s1586_s11 + $0x168] sm:$0xff] }
  0x58   : > { %789 = vmatprep.subr.mxu1 %v344_v1  ;;  %719 = vmatpush2.msra.mxu0 %v279_v2  ;;  %v326_v40 = vld [vmem:[%s1586_s11 + $0x368] sm:$0xff]  ;;  %v261_v43 = vld [vmem:[%s1586_s11 + $0x160] sm:$0xff]  ;;  %v260_v45 = vld [vmem:[%s1586_s11 + $0x158] sm:$0xff] }
  0x59   : > { %790 = vmatpush2.msra.mxu1 %v343_v3  ;;  %720 = vmatprep.subr.mxu0 %v278_v4  ;;  %v325_v44 = vld [vmem:[%s1586_s11 + $0x360] sm:$0xff]  ;;  %v324_v46 = vld [vmem:[%s1586_s11 + $0x358] sm:$0xff]  ;;  %v259_v48 = vld [vmem:[%s1586_s11 + $0x150] sm:$0xff] }
  0x5a   : > { %791 = vmatprep.subr.mxu1 %v342_v5  ;;  %721 = vmatpush2.msra.mxu0 %v277_v6  ;;  %v213_v47 = vld [vmem:[%s2044_s0] sm:$0xff]  ;;  %v323_v49 = vld [vmem:[%s1586_s11 + $0x350] sm:$0xff]  ;;  %v258_v50 = vld [vmem:[%s1586_s11 + $0x148] sm:$0xff] }
  0x5b   : > { %792 = vmatpush2.msra.mxu1 %v341_v7  ;;  %722 = vmatprep.subr.mxu0 %v276_v8  ;;  %v322_v51 = vld [vmem:[%s1586_s11 + $0x348] sm:$0xff]  ;;  %v257_v53 = vld [vmem:[%s1586_s11 + $0x140] sm:$0xff]  ;;  %v613_v55 = vcombine.high %v213_v47, %v213_v47  ;;  %v256_v56 = vld [vmem:[%s1586_s11 + $0x138] sm:$0xff]  ;;  %v620_v62 = vrot.slane %v213_v47, %v1705_v52 }
  0x5c   : > { %793 = vmatprep.subr.mxu1 %v340_v9  ;;  %723 = vmatpush2.msra.mxu0 %v275_v10  ;;  %v321_v54 = vld [vmem:[%s1586_s11 + $0x340] sm:$0xff]  ;;  %v320_v57 = vld [vmem:[%s1586_s11 + $0x338] sm:$0xff]  ;;  %v255_v58 = vld [vmem:[%s1586_s11 + $0x130] sm:$0xff] }
  0x5d   : > { %794 = vmatpush2.msra.mxu1 %v339_v11  ;;  %724 = vmatprep.subr.mxu0 %v274_v12  ;;  %v319_v59 = vld [vmem:[%s1586_s11 + $0x330] sm:$0xff]  ;;  %v254_v60 = vld [vmem:[%s1586_s11 + $0x128] sm:$0xff]  ;;  %v253_v63 = vld [vmem:[%s1586_s11 + $0x120] sm:$0xff]  ;;  %v627_v1 = vrot.slane %v613_v55, %v1705_v52  ;;  %v628_v8 = vcombine.high %v620_v62, %v620_v62 }
  0x5e   : > { %795 = vmatprep.subr.mxu1 %v338_v13  ;;  %725 = vmatpush2.msra.mxu0 %v273_v14  ;;  %v318_v61 = vld [vmem:[%s1586_s11 + $0x328] sm:$0xff]  ;;  %v317_v0 = vld [vmem:[%s1586_s11 + $0x320] sm:$0xff]  ;;  %v252_v2 = vld [vmem:[%s1586_s11 + $0x118] sm:$0xff] }
  0x5f   : > { %796 = vmatpush2.msra.mxu1 %v337_v15  ;;  %726 = vmatprep.subr.mxu0 %v272_v16  ;;  %v316_v3 = vld [vmem:[%s1586_s11 + $0x318] sm:$0xff]  ;;  %v251_v4 = vld [vmem:[%s1586_s11 + $0x110] sm:$0xff]  ;;  %v250_v6 = vld [vmem:[%s1586_s11 + $0x108] sm:$0xff]  ;;  %v629_v10 = vcombine.high %v627_v1, %v627_v1 }
  0x60   : > { %797 = vmatprep.subr.mxu1 %v336_v17  ;;  %727 = vmatpush2.msra.mxu0 %v271_v18  ;;  %v315_v5 = vld [vmem:[%s1586_s11 + $0x310] sm:$0xff]  ;;  %v314_v7 = vld [vmem:[%s1586_s11 + $0x308] sm:$0xff]  ;;  %v249_v9 = vld [vmem:[%s1586_s11 + $0x100] sm:$0xff] }
  0x61   : > { %798 = vmatpush2.msra.mxu1 %v335_v19  ;;  %728 = vmatprep.subr.mxu0 %v270_v20  ;;  %v313_v11 = vld [vmem:[%s1586_s11 + $0x300] sm:$0xff]  ;;  %v376_v12 = vld [vmem:[%s1586_s11 + $0x4f8] sm:$0xff]  ;;  %v375_v14 = vld [vmem:[%s1586_s11 + $0x4f0] sm:$0xff] }
  0x62   : > { %799 = vmatprep.subr.mxu1 %v334_v21  ;;  %729 = vmatpush2.msra.mxu0 %v269_v22  ;;  %v440_v13 = vld [vmem:[%s1586_s11 + $0x6f8] sm:$0xff]  ;;  %v439_v15 = vld [vmem:[%s1586_s11 + $0x6f0] sm:$0xff]  ;;  %v374_v16 = vld [vmem:[%s1586_s11 + $0x4e8] sm:$0xff] }
  0x63   : > { %800 = vmatpush2.msra.mxu1 %v333_v23  ;;  %730 = vmatprep.subr.mxu0 %v268_v24  ;;  %v438_v17 = vld [vmem:[%s1586_s11 + $0x6e8] sm:$0xff]  ;;  %v373_v18 = vld [vmem:[%s1586_s11 + $0x4e0] sm:$0xff]  ;;  %v372_v20 = vld [vmem:[%s1586_s11 + $0x4d8] sm:$0xff] }
  0x64   : > { %801 = vmatprep.subr.mxu1 %v332_v25  ;;  %731 = vmatpush2.msra.mxu0 %v267_v26  ;;  %v437_v19 = vld [vmem:[%s1586_s11 + $0x6e0] sm:$0xff]  ;;  %v436_v21 = vld [vmem:[%s1586_s11 + $0x6d8] sm:$0xff]  ;;  %v371_v22 = vld [vmem:[%s1586_s11 + $0x4d0] sm:$0xff] }
  0x65   : > { %802 = vmatpush2.msra.mxu1 %v331_v27  ;;  %732 = vmatprep.subr.mxu0 %v266_v28  ;;  %v435_v23 = vld [vmem:[%s1586_s11 + $0x6d0] sm:$0xff]  ;;  %v370_v24 = vld [vmem:[%s1586_s11 + $0x4c8] sm:$0xff]  ;;  %v369_v26 = vld [vmem:[%s1586_s11 + $0x4c0] sm:$0xff] }
  0x66   : > { %803 = vmatprep.subr.mxu1 %v330_v29  ;;  %733 = vmatpush2.msra.mxu0 %v265_v33  ;;  %v434_v25 = vld [vmem:[%s1586_s11 + $0x6c8] sm:$0xff]  ;;  %v433_v27 = vld [vmem:[%s1586_s11 + $0x6c0] sm:$0xff]  ;;  %v368_v28 = vld [vmem:[%s1586_s11 + $0x4b8] sm:$0xff] }
  0x67   : > { %804 = vmatpush2.msra.mxu1 %v329_v34  ;;  %734 = vmatprep.subr.mxu0 %v264_v35  ;;  %v432_v29 = vld [vmem:[%s1586_s11 + $0x6b8] sm:$0xff]  ;;  %v367_v30 = vld [vmem:[%s1586_s11 + $0x4b0] sm:$0xff]  ;;  %v366_v32 = vld [vmem:[%s1586_s11 + $0x4a8] sm:$0xff] }
  0x68   : > { %805 = vmatprep.subr.mxu1 %v328_v36  ;;  %735 = vmatpush2.msra.mxu0 %v263_v37  ;;  %v431_v31 = vld [vmem:[%s1586_s11 + $0x6b0] sm:$0xff]  ;;  %v430_v33 = vld [vmem:[%s1586_s11 + $0x6a8] sm:$0xff]  ;;  %v365_v34 = vld [vmem:[%s1586_s11 + $0x4a0] sm:$0xff] }
  0x69   : > { %806 = vmatpush2.msra.mxu1 %v327_v38  ;;  %736 = vmatprep.subr.mxu0 %v262_v39  ;;  %v429_v35 = vld [vmem:[%s1586_s11 + $0x6a0] sm:$0xff]  ;;  %v364_v36 = vld [vmem:[%s1586_s11 + $0x498] sm:$0xff]  ;;  %v363_v38 = vld [vmem:[%s1586_s11 + $0x490] sm:$0xff] }
  0x6a   : > { %807 = vmatprep.subr.mxu1 %v326_v40  ;;  %737 = vmatpush2.msra.mxu0 %v261_v43  ;;  %v428_v37 = vld [vmem:[%s1586_s11 + $0x698] sm:$0xff]  ;;  %v427_v39 = vld [vmem:[%s1586_s11 + $0x690] sm:$0xff]  ;;  %v362_v40 = vld [vmem:[%s1586_s11 + $0x488] sm:$0xff] }
  0x6b   : > { %808 = vmatpush2.msra.mxu1 %v325_v44  ;;  %738 = vmatprep.subr.mxu0 %v260_v45  ;;  %v426_v41 = vld [vmem:[%s1586_s11 + $0x688] sm:$0xff]  ;;  %v361_v42 = vld [vmem:[%s1586_s11 + $0x480] sm:$0xff]  ;;  %v360_v44 = vld [vmem:[%s1586_s11 + $0x478] sm:$0xff] }
  0x6c   : > { %809 = vmatprep.subr.mxu1 %v324_v46  ;;  %739 = vmatpush2.msra.mxu0 %v259_v48  ;;  %v425_v43 = vld [vmem:[%s1586_s11 + $0x680] sm:$0xff]  ;;  %v424_v45 = vld [vmem:[%s1586_s11 + $0x678] sm:$0xff]  ;;  %v359_v46 = vld [vmem:[%s1586_s11 + $0x470] sm:$0xff] }
  0x6d   : > { %810 = vmatpush2.msra.mxu1 %v323_v49  ;;  %740 = vmatprep.subr.mxu0 %v258_v50  ;;  %v423_v47 = vld [vmem:[%s1586_s11 + $0x670] sm:$0xff]  ;;  %v358_v48 = vld [vmem:[%s1586_s11 + $0x468] sm:$0xff]  ;;  %v357_v50 = vld [vmem:[%s1586_s11 + $0x460] sm:$0xff] }
  0x6e   : > { %811 = vmatprep.subr.mxu1 %v322_v51  ;;  %741 = vmatpush2.msra.mxu0 %v257_v53  ;;  %v422_v49 = vld [vmem:[%s1586_s11 + $0x668] sm:$0xff]  ;;  %v421_v51 = vld [vmem:[%s1586_s11 + $0x660] sm:$0xff]  ;;  %v356_v53 = vld [vmem:[%s1586_s11 + $0x458] sm:$0xff] }
  0x6f   : > { %812 = vmatpush2.msra.mxu1 %v321_v54  ;;  %742 = vmatprep.subr.mxu0 %v256_v56  ;;  %v420_v54 = vld [vmem:[%s1586_s11 + $0x658] sm:$0xff]  ;;  %v355_v55 = vld [vmem:[%s1586_s11 + $0x450] sm:$0xff] }
  0x70   : > { %813 = vmatprep.subr.mxu1 %v320_v57  ;;  %743 = vmatpush2.msra.mxu0 %v255_v58  ;;  %v419_v56 = vld [vmem:[%s1586_s11 + $0x650] sm:$0xff]  ;;  %v354_v57 = vld [vmem:[%s1586_s11 + $0x448] sm:$0xff] }
  0x71   : > { %814 = vmatpush2.msra.mxu1 %v319_v59  ;;  %744 = vmatprep.subr.mxu0 %v254_v60  ;;  %v418_v58 = vld [vmem:[%s1586_s11 + $0x648] sm:$0xff]  ;;  %v353_v59 = vld [vmem:[%s1586_s11 + $0x440] sm:$0xff] }
  0x72   : > { %815 = vmatprep.subr.mxu1 %v318_v61  ;;  %745 = vmatpush2.msra.mxu0 %v253_v63  ;;  %v417_v60 = vld [vmem:[%s1586_s11 + $0x640] sm:$0xff]  ;;  %v352_v61 = vld [vmem:[%s1586_s11 + $0x438] sm:$0xff]  ;;  %v351_v63 = vld [vmem:[%s1586_s11 + $0x430] sm:$0xff] }
  0x73   : > { %816 = vmatpush2.msra.mxu1 %v317_v0  ;;  %746 = vmatprep.subr.mxu0 %v252_v2  ;;  %v415_v0 = vld [vmem:[%s1586_s11 + $0x630] sm:$0xff]  ;;  %v414_v2 = vld [vmem:[%s1586_s11 + $0x628] sm:$0xff] }
  0x74   : > { %817 = vmatprep.subr.mxu1 %v316_v3  ;;  %747 = vmatpush2.msra.mxu0 %v251_v4  ;;  %v349_v3 = vld [vmem:[%s1586_s11 + $0x420] sm:$0xff] }
  0x75   : > { %818 = vmatpush2.msra.mxu1 %v315_v5  ;;  %748 = vmatprep.subr.mxu0 %v250_v6  ;;  %v413_v4 = vld [vmem:[%s1586_s11 + $0x620] sm:$0xff]  ;;  %v348_v5 = vld [vmem:[%s1586_s11 + $0x418] sm:$0xff] }
  0x76   : > { %819 = vmatprep.subr.mxu1 %v314_v7  ;;  %749 = vmatpush2.msra.mxu0 %v249_v9  ;;  %v412_v6 = vld [vmem:[%s1586_s11 + $0x618] sm:$0xff]  ;;  %v347_v7 = vld [vmem:[%s1586_s11 + $0x410] sm:$0xff]  ;;  %v346_v9 = vld [vmem:[%s1586_s11 + $0x408] sm:$0xff] }
  0x77   : > { %750 = vmatprep.mubr.f32.mxu0 %v628_v8  ;;  %820 = vmatpush2.msra.mxu1 %v313_v11  ;;  %v411_v8 = vld [vmem:[%s1586_s11 + $0x610] sm:$0xff]  ;;  %v345_v11 = vld [vmem:[%s1586_s11 + $0x400] sm:$0xff] }
  0x78   : > { %821 = vmatprep.mubr.f32.mxu1 %v629_v10  ;;  %751 = vmatmul.mubr.f32.vlgmr.msra.gmra.mxu0 %v620_v62  ;;  %v416_v62 = vld [vmem:[%s1586_s11 + $0x638] sm:$0xff]  ;;  %v410_v10 = vld [vmem:[%s1586_s11 + $0x608] sm:$0xff] }
  0x79   : > { %822 = vmatmul.mubr.f32.vlgmr.msra.gmra.mxu1 %v627_v1  ;;  %828 = vmatprep.subr.mxu0 %v376_v12  ;;  %v350_v1 = vld [vmem:[%s1586_s11 + $0x428] sm:$0xff]  ;;  %v409_v12 = vld [vmem:[%s1586_s11 + $0x600] sm:$0xff] }
  0x7a   : > { %899 = vmatprep.subr.mxu1 %v440_v13  ;;  %829 = vmatpush1.msra.mxu0 %v375_v14  ;;  %v408_v13 = vld [vmem:[%s1586_s11 + $0x5f8] sm:$0xff] }
  0x7b   : > { %900 = vmatpush1.msra.mxu1 %v439_v15  ;;  %830 = vmatprep.subr.mxu0 %v374_v16  ;;  %v472_v14 = vld [vmem:[%s1586_s11 + $0x7f8] sm:$0xff]  ;;  %v407_v15 = vld [vmem:[%s1586_s11 + $0x5f0] sm:$0xff] }
  0x7c   : > { %901 = vmatprep.subr.mxu1 %v438_v17  ;;  %831 = vmatpush1.msra.mxu0 %v373_v18  ;;  %v471_v16 = vld [vmem:[%s1586_s11 + $0x7f0] sm:$0xff]  ;;  %v406_v17 = vld [vmem:[%s1586_s11 + $0x5e8] sm:$0xff] }
  0x7d   : > { %902 = vmatpush1.msra.mxu1 %v437_v19  ;;  %832 = vmatprep.subr.mxu0 %v372_v20  ;;  %v470_v18 = vld [vmem:[%s1586_s11 + $0x7e8] sm:$0xff]  ;;  %v405_v19 = vld [vmem:[%s1586_s11 + $0x5e0] sm:$0xff] }
  0x7e   : > { %903 = vmatprep.subr.mxu1 %v436_v21  ;;  %833 = vmatpush1.msra.mxu0 %v371_v22  ;;  %v469_v20 = vld [vmem:[%s1586_s11 + $0x7e0] sm:$0xff]  ;;  %v404_v21 = vld [vmem:[%s1586_s11 + $0x5d8] sm:$0xff] }
  0x7f   : > { %904 = vmatpush1.msra.mxu1 %v435_v23  ;;  %834 = vmatprep.subr.mxu0 %v370_v24  ;;  %v468_v22 = vld [vmem:[%s1586_s11 + $0x7d8] sm:$0xff]  ;;  %v403_v23 = vld [vmem:[%s1586_s11 + $0x5d0] sm:$0xff] }
  0x80   : > { %905 = vmatprep.subr.mxu1 %v434_v25  ;;  %835 = vmatpush1.msra.mxu0 %v369_v26  ;;  %v467_v24 = vld [vmem:[%s1586_s11 + $0x7d0] sm:$0xff]  ;;  %v402_v25 = vld [vmem:[%s1586_s11 + $0x5c8] sm:$0xff] }
  0x81   : > { %906 = vmatpush1.msra.mxu1 %v433_v27  ;;  %836 = vmatprep.subr.mxu0 %v368_v28  ;;  %v466_v26 = vld [vmem:[%s1586_s11 + $0x7c8] sm:$0xff]  ;;  %v401_v27 = vld [vmem:[%s1586_s11 + $0x5c0] sm:$0xff] }
  0x82   : > { %907 = vmatprep.subr.mxu1 %v432_v29  ;;  %837 = vmatpush1.msra.mxu0 %v367_v30  ;;  %v465_v28 = vld [vmem:[%s1586_s11 + $0x7c0] sm:$0xff]  ;;  %v400_v29 = vld [vmem:[%s1586_s11 + $0x5b8] sm:$0xff] }
  0x83   : > { %908 = vmatpush1.msra.mxu1 %v431_v31  ;;  %838 = vmatprep.subr.mxu0 %v366_v32  ;;  %v464_v30 = vld [vmem:[%s1586_s11 + $0x7b8] sm:$0xff]  ;;  %v399_v31 = vld [vmem:[%s1586_s11 + $0x5b0] sm:$0xff] }
  0x84   : > { %909 = vmatprep.subr.mxu1 %v430_v33  ;;  %839 = vmatpush1.msra.mxu0 %v365_v34  ;;  %v463_v32 = vld [vmem:[%s1586_s11 + $0x7b0] sm:$0xff]  ;;  %v398_v33 = vld [vmem:[%s1586_s11 + $0x5a8] sm:$0xff] }
  0x85   : > { %910 = vmatpush1.msra.mxu1 %v429_v35  ;;  %840 = vmatprep.subr.mxu0 %v364_v36  ;;  %v462_v34 = vld [vmem:[%s1586_s11 + $0x7a8] sm:$0xff]  ;;  %v397_v35 = vld [vmem:[%s1586_s11 + $0x5a0] sm:$0xff] }
  0x86   : > { %911 = vmatprep.subr.mxu1 %v428_v37  ;;  %841 = vmatpush1.msra.mxu0 %v363_v38  ;;  %v461_v36 = vld [vmem:[%s1586_s11 + $0x7a0] sm:$0xff]  ;;  %v396_v37 = vld [vmem:[%s1586_s11 + $0x598] sm:$0xff] }
  0x87   : > { %912 = vmatpush1.msra.mxu1 %v427_v39  ;;  %842 = vmatprep.subr.mxu0 %v362_v40  ;;  %v460_v38 = vld [vmem:[%s1586_s11 + $0x798] sm:$0xff]  ;;  %v395_v39 = vld [vmem:[%s1586_s11 + $0x590] sm:$0xff] }
  0x88   : > { %913 = vmatprep.subr.mxu1 %v426_v41  ;;  %843 = vmatpush1.msra.mxu0 %v361_v42  ;;  %v459_v40 = vld [vmem:[%s1586_s11 + $0x790] sm:$0xff]  ;;  %v394_v41 = vld [vmem:[%s1586_s11 + $0x588] sm:$0xff] }
  0x89   : > { %914 = vmatpush1.msra.mxu1 %v425_v43  ;;  %844 = vmatprep.subr.mxu0 %v360_v44  ;;  %v458_v42 = vld [vmem:[%s1586_s11 + $0x788] sm:$0xff]  ;;  %v393_v43 = vld [vmem:[%s1586_s11 + $0x580] sm:$0xff] }
  0x8a   : > { %915 = vmatprep.subr.mxu1 %v424_v45  ;;  %845 = vmatpush1.msra.mxu0 %v359_v46  ;;  %v457_v44 = vld [vmem:[%s1586_s11 + $0x780] sm:$0xff]  ;;  %v392_v45 = vld [vmem:[%s1586_s11 + $0x578] sm:$0xff] }
  0x8b   : > { %916 = vmatpush1.msra.mxu1 %v423_v47  ;;  %846 = vmatprep.subr.mxu0 %v358_v48  ;;  %v456_v46 = vld [vmem:[%s1586_s11 + $0x778] sm:$0xff]  ;;  %v391_v47 = vld [vmem:[%s1586_s11 + $0x570] sm:$0xff] }
  0x8c   : > { %917 = vmatprep.subr.mxu1 %v422_v49  ;;  %847 = vmatpush1.msra.mxu0 %v357_v50  ;;  %v455_v48 = vld [vmem:[%s1586_s11 + $0x770] sm:$0xff]  ;;  %v390_v49 = vld [vmem:[%s1586_s11 + $0x568] sm:$0xff] }
  0x8d   : > { %918 = vmatpush1.msra.mxu1 %v421_v51  ;;  %848 = vmatprep.subr.mxu0 %v356_v53  ;;  %v454_v50 = vld [vmem:[%s1586_s11 + $0x768] sm:$0xff]  ;;  %v389_v51 = vld [vmem:[%s1586_s11 + $0x560] sm:$0xff] }
  0x8e   : > { %919 = vmatprep.subr.mxu1 %v420_v54  ;;  %849 = vmatpush1.msra.mxu0 %v355_v55  ;;  %v453_v53 = vld [vmem:[%s1586_s11 + $0x760] sm:$0xff]  ;;  %v388_v54 = vld [vmem:[%s1586_s11 + $0x558] sm:$0xff] }
  0x8f   : > { %920 = vmatpush1.msra.mxu1 %v419_v56  ;;  %850 = vmatprep.subr.mxu0 %v354_v57  ;;  %v452_v55 = vld [vmem:[%s1586_s11 + $0x758] sm:$0xff]  ;;  %v387_v56 = vld [vmem:[%s1586_s11 + $0x550] sm:$0xff] }
  0x90   : > { %921 = vmatprep.subr.mxu1 %v418_v58  ;;  %851 = vmatpush1.msra.mxu0 %v353_v59  ;;  %v451_v57 = vld [vmem:[%s1586_s11 + $0x750] sm:$0xff]  ;;  %v214_v58 = vld [vmem:[%s2044_s0 + $0x8] sm:$0xff] }
  0x91   : > { %922 = vmatpush1.msra.mxu1 %v417_v60  ;;  %852 = vmatprep.subr.mxu0 %v352_v61  ;;  %v386_v59 = vld [vmem:[%s1586_s11 + $0x548] sm:$0xff]  ;;  %v385_v61 = vld [vmem:[%s1586_s11 + $0x540] sm:$0xff] }
  0x92   : > { %923 = vmatprep.subr.mxu1 %v416_v62  ;;  %853 = vmatpush1.msra.mxu0 %v351_v63  ;;  %v450_v60 = vld [vmem:[%s1586_s11 + $0x748] sm:$0xff]  ;;  %v449_v62 = vld [vmem:[%s1586_s11 + $0x740] sm:$0xff]  ;;  %v384_v63 = vld [vmem:[%s1586_s11 + $0x538] sm:$0xff] }
  0x93   : > { %924 = vmatpush1.msra.mxu1 %v415_v0  ;;  %854 = vmatprep.subr.mxu0 %v350_v1  ;;  %v448_v0 = vld [vmem:[%s1586_s11 + $0x738] sm:$0xff]  ;;  %v637_v1 = vrot.slane %v214_v58, %v1705_v52 }
  0x94   : > { %925 = vmatprep.subr.mxu1 %v414_v2  ;;  %855 = vmatpush1.msra.mxu0 %v349_v3  ;;  %v630_v2 = vcombine.high %v214_v58, %v214_v58  ;;  %v383_v3 = vld [vmem:[%s1586_s11 + $0x530] sm:$0xff] }
  0x95   : > { %926 = vmatpush1.msra.mxu1 %v413_v4  ;;  %856 = vmatprep.subr.mxu0 %v348_v5  ;;  %v447_v4 = vld [vmem:[%s1586_s11 + $0x730] sm:$0xff]  ;;  %v382_v5 = vld [vmem:[%s1586_s11 + $0x528] sm:$0xff] }
  0x96   : > { %927 = vmatprep.subr.mxu1 %v412_v6  ;;  %857 = vmatpush1.msra.mxu0 %v347_v7  ;;  %v446_v6 = vld [vmem:[%s1586_s11 + $0x728] sm:$0xff]  ;;  %v381_v7 = vld [vmem:[%s1586_s11 + $0x520] sm:$0xff]  ;;  %v551_v58 = vld [vmem:[%s1586_s11 + $0xa70] sm:$0xff] }
  0x97   : > { %928 = vmatpush1.msra.mxu1 %v411_v8  ;;  %858 = vmatprep.subr.mxu0 %v346_v9  ;;  %v445_v8 = vld [vmem:[%s1586_s11 + $0x720] sm:$0xff]  ;;  %v380_v9 = vld [vmem:[%s1586_s11 + $0x518] sm:$0xff] }
  0x98   : > { %929 = vmatprep.subr.mxu1 %v410_v10  ;;  %859 = vmatpush1.msra.mxu0 %v345_v11  ;;  %v444_v10 = vld [vmem:[%s1586_s11 + $0x718] sm:$0xff]  ;;  %v645_v11 = vcombine.high %v637_v1, %v637_v1 }
  0x99   : > { %930 = vmatpush1.msra.mxu1 %v409_v12  ;;  %860 = vmatprep.subr.mxu0 %v408_v13  ;;  %v644_v12 = vrot.slane %v630_v2, %v1705_v52  ;;  %v379_v13 = vld [vmem:[%s1586_s11 + $0x510] sm:$0xff] }
  0x9a   : > { %931 = vmatprep.subr.mxu1 %v472_v14  ;;  %861 = vmatpush2.msra.mxu0 %v407_v15  ;;  %v378_v14 = vld [vmem:[%s1586_s11 + $0x508] sm:$0xff]  ;;  %v443_v15 = vld [vmem:[%s1586_s11 + $0x710] sm:$0xff] }
  0x9b   : > { %932 = vmatpush2.msra.mxu1 %v471_v16  ;;  %862 = vmatprep.subr.mxu0 %v406_v17  ;;  %v377_v16 = vld [vmem:[%s1586_s11 + $0x500] sm:$0xff]  ;;  %v442_v17 = vld [vmem:[%s1586_s11 + $0x708] sm:$0xff]  ;;  %v547_v2 = vld [vmem:[%s1586_s11 + $0xa50] sm:$0xff] }
  0x9c   : > { %933 = vmatprep.subr.mxu1 %v470_v18  ;;  %863 = vmatpush2.msra.mxu0 %v405_v19  ;;  %v504_v18 = vld [vmem:[%s1586_s11 + $0x8f8] sm:$0xff]  ;;  %v646_v19 = vcombine.high %v644_v12, %v644_v12 }
  0x9d   : > { %934 = vmatpush2.msra.mxu1 %v469_v20  ;;  %864 = vmatprep.subr.mxu0 %v404_v21  ;;  %v441_v20 = vld [vmem:[%s1586_s11 + $0x700] sm:$0xff]  ;;  %v503_v21 = vld [vmem:[%s1586_s11 + $0x8f0] sm:$0xff] }
  0x9e   : > { %935 = vmatprep.subr.mxu1 %v468_v22  ;;  %865 = vmatpush2.msra.mxu0 %v403_v23  ;;  %v502_v22 = vld [vmem:[%s1586_s11 + $0x8e8] sm:$0xff]  ;;  %v568_v23 = vld [vmem:[%s1586_s11 + $0xaf8] sm:$0xff] }
  0x9f   : > { %936 = vmatpush2.msra.mxu1 %v467_v24  ;;  %866 = vmatprep.subr.mxu0 %v402_v25  ;;  %v501_v24 = vld [vmem:[%s1586_s11 + $0x8e0] sm:$0xff]  ;;  %v567_v25 = vld [vmem:[%s1586_s11 + $0xaf0] sm:$0xff] }
  0xa0   : > { %937 = vmatprep.subr.mxu1 %v466_v26  ;;  %867 = vmatpush2.msra.mxu0 %v401_v27  ;;  %v500_v26 = vld [vmem:[%s1586_s11 + $0x8d8] sm:$0xff]  ;;  %v566_v27 = vld [vmem:[%s1586_s11 + $0xae8] sm:$0xff] }
  0xa1   : > { %938 = vmatpush2.msra.mxu1 %v465_v28  ;;  %868 = vmatprep.subr.mxu0 %v400_v29  ;;  %v499_v28 = vld [vmem:[%s1586_s11 + $0x8d0] sm:$0xff]  ;;  %v565_v29 = vld [vmem:[%s1586_s11 + $0xae0] sm:$0xff] }
  0xa2   : > { %939 = vmatprep.subr.mxu1 %v464_v30  ;;  %869 = vmatpush2.msra.mxu0 %v399_v31  ;;  %v498_v30 = vld [vmem:[%s1586_s11 + $0x8c8] sm:$0xff]  ;;  %v564_v31 = vld [vmem:[%s1586_s11 + $0xad8] sm:$0xff] }
  0xa3   : > { %940 = vmatpush2.msra.mxu1 %v463_v32  ;;  %870 = vmatprep.subr.mxu0 %v398_v33  ;;  %v497_v32 = vld [vmem:[%s1586_s11 + $0x8c0] sm:$0xff]  ;;  %v563_v33 = vld [vmem:[%s1586_s11 + $0xad0] sm:$0xff] }
  0xa4   : > { %941 = vmatprep.subr.mxu1 %v462_v34  ;;  %871 = vmatpush2.msra.mxu0 %v397_v35  ;;  %v496_v34 = vld [vmem:[%s1586_s11 + $0x8b8] sm:$0xff]  ;;  %v562_v35 = vld [vmem:[%s1586_s11 + $0xac8] sm:$0xff] }
  0xa5   : > { %942 = vmatpush2.msra.mxu1 %v461_v36  ;;  %872 = vmatprep.subr.mxu0 %v396_v37  ;;  %v495_v36 = vld [vmem:[%s1586_s11 + $0x8b0] sm:$0xff]  ;;  %v561_v37 = vld [vmem:[%s1586_s11 + $0xac0] sm:$0xff] }
  0xa6   : > { %943 = vmatprep.subr.mxu1 %v460_v38  ;;  %873 = vmatpush2.msra.mxu0 %v395_v39  ;;  %v494_v38 = vld [vmem:[%s1586_s11 + $0x8a8] sm:$0xff]  ;;  %v560_v39 = vld [vmem:[%s1586_s11 + $0xab8] sm:$0xff] }
  0xa7   : > { %944 = vmatpush2.msra.mxu1 %v459_v40  ;;  %874 = vmatprep.subr.mxu0 %v394_v41  ;;  %v493_v40 = vld [vmem:[%s1586_s11 + $0x8a0] sm:$0xff]  ;;  %v559_v41 = vld [vmem:[%s1586_s11 + $0xab0] sm:$0xff] }
  0xa8   : > { %945 = vmatprep.subr.mxu1 %v458_v42  ;;  %875 = vmatpush2.msra.mxu0 %v393_v43  ;;  %v492_v42 = vld [vmem:[%s1586_s11 + $0x898] sm:$0xff]  ;;  %v558_v43 = vld [vmem:[%s1586_s11 + $0xaa8] sm:$0xff] }
  0xa9   : > { %946 = vmatpush2.msra.mxu1 %v457_v44  ;;  %876 = vmatprep.subr.mxu0 %v392_v45  ;;  %v491_v44 = vld [vmem:[%s1586_s11 + $0x890] sm:$0xff]  ;;  %v557_v45 = vld [vmem:[%s1586_s11 + $0xaa0] sm:$0xff] }
  0xaa   : > { %947 = vmatprep.subr.mxu1 %v456_v46  ;;  %877 = vmatpush2.msra.mxu0 %v391_v47  ;;  %v490_v46 = vld [vmem:[%s1586_s11 + $0x888] sm:$0xff]  ;;  %v556_v47 = vld [vmem:[%s1586_s11 + $0xa98] sm:$0xff] }
  0xab   : > { %948 = vmatpush2.msra.mxu1 %v455_v48  ;;  %878 = vmatprep.subr.mxu0 %v390_v49  ;;  %v489_v48 = vld [vmem:[%s1586_s11 + $0x880] sm:$0xff]  ;;  %v555_v49 = vld [vmem:[%s1586_s11 + $0xa90] sm:$0xff] }
  0xac   : > { %949 = vmatprep.subr.mxu1 %v454_v50  ;;  %879 = vmatpush2.msra.mxu0 %v389_v51  ;;  %v488_v50 = vld [vmem:[%s1586_s11 + $0x878] sm:$0xff]  ;;  %v554_v51 = vld [vmem:[%s1586_s11 + $0xa88] sm:$0xff] }
  0xad   : > { %950 = vmatpush2.msra.mxu1 %v453_v53  ;;  %880 = vmatprep.subr.mxu0 %v388_v54  ;;  %v487_v53 = vld [vmem:[%s1586_s11 + $0x870] sm:$0xff]  ;;  %v553_v54 = vld [vmem:[%s1586_s11 + $0xa80] sm:$0xff] }
  0xae   : > { %951 = vmatprep.subr.mxu1 %v452_v55  ;;  %881 = vmatpush2.msra.mxu0 %v387_v56  ;;  %v486_v55 = vld [vmem:[%s1586_s11 + $0x868] sm:$0xff]  ;;  %v552_v56 = vld [vmem:[%s1586_s11 + $0xa78] sm:$0xff] }
  0xaf   : > { %952 = vmatpush2.msra.mxu1 %v451_v57  ;;  %882 = vmatprep.subr.mxu0 %v386_v59  ;;  %v485_v57 = vld [vmem:[%s1586_s11 + $0x860] sm:$0xff]  ;;  %v484_v59 = vld [vmem:[%s1586_s11 + $0x858] sm:$0xff] }
  0xb0   : > { %953 = vmatprep.subr.mxu1 %v450_v60  ;;  %883 = vmatpush2.msra.mxu0 %v385_v61  ;;  %v550_v60 = vld [vmem:[%s1586_s11 + $0xa68] sm:$0xff]  ;;  %v483_v61 = vld [vmem:[%s1586_s11 + $0x850] sm:$0xff] }
  0xb1   : > { %954 = vmatpush2.msra.mxu1 %v449_v62  ;;  %884 = vmatprep.subr.mxu0 %v384_v63  ;;  %v549_v62 = vld [vmem:[%s1586_s11 + $0xa60] sm:$0xff]  ;;  %v482_v63 = vld [vmem:[%s1586_s11 + $0x848] sm:$0xff] }
  0xb2   : > { %955 = vmatprep.subr.mxu1 %v448_v0  ;;  %885 = vmatpush2.msra.mxu0 %v383_v3  ;;  %v548_v0 = vld [vmem:[%s1586_s11 + $0xa58] sm:$0xff] }
  0xb3   : > { %956 = vmatpush2.msra.mxu1 %v447_v4  ;;  %886 = vmatprep.subr.mxu0 %v382_v5  ;;  %v480_v3 = vld [vmem:[%s1586_s11 + $0x838] sm:$0xff]  ;;  %v546_v4 = vld [vmem:[%s1586_s11 + $0xa48] sm:$0xff]  ;;  %v479_v5 = vld [vmem:[%s1586_s11 + $0x830] sm:$0xff] }
  0xb4   : > { %957 = vmatprep.subr.mxu1 %v446_v6  ;;  %887 = vmatpush2.msra.mxu0 %v381_v7  ;;  %v545_v6 = vld [vmem:[%s1586_s11 + $0xa40] sm:$0xff]  ;;  %v478_v7 = vld [vmem:[%s1586_s11 + $0x828] sm:$0xff] }
  0xb5   : > { %958 = vmatpush2.msra.mxu1 %v445_v8  ;;  %888 = vmatprep.subr.mxu0 %v380_v9  ;;  %v544_v8 = vld [vmem:[%s1586_s11 + $0xa38] sm:$0xff]  ;;  %v477_v9 = vld [vmem:[%s1586_s11 + $0x820] sm:$0xff] }
  0xb6   : > { %959 = vmatprep.subr.mxu1 %v444_v10  ;;  %889 = vmatpush2.msra.mxu0 %v379_v13  ;;  %v543_v10 = vld [vmem:[%s1586_s11 + $0xa30] sm:$0xff] }
  0xb7   : > { %892 = vmatprep.mubr.f32.mxu0 %v645_v11  ;;  %890 = vmatprep.subr.mxu0 %v378_v14  ;;  %v476_v11 = vld [vmem:[%s1586_s11 + $0x818] sm:$0xff]  ;;  %v475_v13 = vld [vmem:[%s1586_s11 + $0x810] sm:$0xff]  ;;  %v541_v14 = vld [vmem:[%s1586_s11 + $0xa20] sm:$0xff] }
  0xb8   : > { %960 = vmatpush2.msra.mxu1 %v443_v15  ;;  %891 = vmatpush2.msra.mxu0 %v377_v16  ;;  %v474_v15 = vld [vmem:[%s1586_s11 + $0x808] sm:$0xff]  ;;  %v540_v16 = vld [vmem:[%s1586_s11 + $0xa18] sm:$0xff] }
  0xb9   : > { %961 = vmatprep.subr.mxu1 %v442_v17  ;;  %893 = vmatmul.mubr.f32.vlgmr.msra.gmra.mxu0 %v637_v1  ;;  %v481_v1 = vld [vmem:[%s1586_s11 + $0x840] sm:$0xff] }
  0xba   : > { %970 = vmatprep.subr.mxu0 %v504_v18  ;;  %962 = vmatpush2.msra.mxu1 %v441_v20  ;;  %v473_v17 = vld [vmem:[%s1586_s11 + $0x800] sm:$0xff]  ;;  %v539_v18 = vld [vmem:[%s1586_s11 + $0xa10] sm:$0xff]  ;;  %v538_v20 = vld [vmem:[%s1586_s11 + $0xa08] sm:$0xff] }
  0xbb   : > { %963 = vmatprep.mubr.f32.mxu1 %v646_v19  ;;  %971 = vmatpush1.msra.mxu0 %v503_v21  ;;  %v536_v19 = vld [vmem:[%s1586_s11 + $0x9f8] sm:$0xff]  ;;  %v535_v21 = vld [vmem:[%s1586_s11 + $0x9f0] sm:$0xff] }
  0xbc   : > { %964 = vmatmul.mubr.f32.vlgmr.msra.gmra.mxu1 %v644_v12  ;;  %972 = vmatprep.subr.mxu0 %v502_v22  ;;  %v542_v12 = vld [vmem:[%s1586_s11 + $0xa28] sm:$0xff]  ;;  %v537_v22 = vld [vmem:[%s1586_s11 + $0xa00] sm:$0xff] }
  0xbd   : > { %1041 = vmatprep.subr.mxu1 %v568_v23  ;;  %973 = vmatpush1.msra.mxu0 %v501_v24  ;;  %v534_v23 = vld [vmem:[%s1586_s11 + $0x9e8] sm:$0xff]  ;;  %v600_v24 = vld [vmem:[%s1586_s11 + $0xbf8] sm:$0xff] }
  0xbe   : > { %1042 = vmatpush1.msra.mxu1 %v567_v25  ;;  %974 = vmatprep.subr.mxu0 %v500_v26  ;;  %v533_v25 = vld [vmem:[%s1586_s11 + $0x9e0] sm:$0xff]  ;;  %v599_v26 = vld [vmem:[%s1586_s11 + $0xbf0] sm:$0xff] }
  0xbf   : > { %1043 = vmatprep.subr.mxu1 %v566_v27  ;;  %975 = vmatpush1.msra.mxu0 %v499_v28  ;;  %v532_v27 = vld [vmem:[%s1586_s11 + $0x9d8] sm:$0xff]  ;;  %v598_v28 = vld [vmem:[%s1586_s11 + $0xbe8] sm:$0xff] }
  0xc0   : > { %1044 = vmatpush1.msra.mxu1 %v565_v29  ;;  %976 = vmatprep.subr.mxu0 %v498_v30  ;;  %v531_v29 = vld [vmem:[%s1586_s11 + $0x9d0] sm:$0xff]  ;;  %v597_v30 = vld [vmem:[%s1586_s11 + $0xbe0] sm:$0xff] }
  0xc1   : > { %1045 = vmatprep.subr.mxu1 %v564_v31  ;;  %977 = vmatpush1.msra.mxu0 %v497_v32  ;;  %v530_v31 = vld [vmem:[%s1586_s11 + $0x9c8] sm:$0xff]  ;;  %v596_v32 = vld [vmem:[%s1586_s11 + $0xbd8] sm:$0xff] }
  0xc2   : > { %1046 = vmatpush1.msra.mxu1 %v563_v33  ;;  %978 = vmatprep.subr.mxu0 %v496_v34  ;;  %v529_v33 = vld [vmem:[%s1586_s11 + $0x9c0] sm:$0xff]  ;;  %v595_v34 = vld [vmem:[%s1586_s11 + $0xbd0] sm:$0xff] }
  0xc3   : > { %1047 = vmatprep.subr.mxu1 %v562_v35  ;;  %979 = vmatpush1.msra.mxu0 %v495_v36  ;;  %v528_v35 = vld [vmem:[%s1586_s11 + $0x9b8] sm:$0xff]  ;;  %v594_v36 = vld [vmem:[%s1586_s11 + $0xbc8] sm:$0xff] }
  0xc4   : > { %1048 = vmatpush1.msra.mxu1 %v561_v37  ;;  %980 = vmatprep.subr.mxu0 %v494_v38  ;;  %v527_v37 = vld [vmem:[%s1586_s11 + $0x9b0] sm:$0xff]  ;;  %v593_v38 = vld [vmem:[%s1586_s11 + $0xbc0] sm:$0xff] }
  0xc5   : > { %1049 = vmatprep.subr.mxu1 %v560_v39  ;;  %981 = vmatpush1.msra.mxu0 %v493_v40  ;;  %v526_v39 = vld [vmem:[%s1586_s11 + $0x9a8] sm:$0xff]  ;;  %v592_v40 = vld [vmem:[%s1586_s11 + $0xbb8] sm:$0xff] }
  0xc6   : > { %1050 = vmatpush1.msra.mxu1 %v559_v41  ;;  %982 = vmatprep.subr.mxu0 %v492_v42  ;;  %v525_v41 = vld [vmem:[%s1586_s11 + $0x9a0] sm:$0xff]  ;;  %v591_v42 = vld [vmem:[%s1586_s11 + $0xbb0] sm:$0xff] }
  0xc7   : > { %1051 = vmatprep.subr.mxu1 %v558_v43  ;;  %983 = vmatpush1.msra.mxu0 %v491_v44  ;;  %v524_v43 = vld [vmem:[%s1586_s11 + $0x998] sm:$0xff]  ;;  %v590_v44 = vld [vmem:[%s1586_s11 + $0xba8] sm:$0xff] }
  0xc8   : > { %1052 = vmatpush1.msra.mxu1 %v557_v45  ;;  %984 = vmatprep.subr.mxu0 %v490_v46  ;;  %v523_v45 = vld [vmem:[%s1586_s11 + $0x990] sm:$0xff]  ;;  %v589_v46 = vld [vmem:[%s1586_s11 + $0xba0] sm:$0xff] }
  0xc9   : > { %1053 = vmatprep.subr.mxu1 %v556_v47  ;;  %985 = vmatpush1.msra.mxu0 %v489_v48  ;;  %v522_v47 = vld [vmem:[%s1586_s11 + $0x988] sm:$0xff]  ;;  %v588_v48 = vld [vmem:[%s1586_s11 + $0xb98] sm:$0xff] }
  0xca   : > { %1054 = vmatpush1.msra.mxu1 %v555_v49  ;;  %986 = vmatprep.subr.mxu0 %v488_v50  ;;  %v521_v49 = vld [vmem:[%s1586_s11 + $0x980] sm:$0xff]  ;;  %v587_v50 = vld [vmem:[%s1586_s11 + $0xb90] sm:$0xff] }
  0xcb   : > { %1055 = vmatprep.subr.mxu1 %v554_v51  ;;  %987 = vmatpush1.msra.mxu0 %v487_v53  ;;  %v520_v51 = vld [vmem:[%s1586_s11 + $0x978] sm:$0xff]  ;;  %v586_v53 = vld [vmem:[%s1586_s11 + $0xb88] sm:$0xff] }
  0xcc   : > { %1056 = vmatpush1.msra.mxu1 %v553_v54  ;;  %988 = vmatprep.subr.mxu0 %v486_v55  ;;  %v519_v54 = vld [vmem:[%s1586_s11 + $0x970] sm:$0xff]  ;;  %v585_v55 = vld [vmem:[%s1586_s11 + $0xb80] sm:$0xff] }
  0xcd   : > { %1057 = vmatprep.subr.mxu1 %v552_v56  ;;  %989 = vmatpush1.msra.mxu0 %v485_v57  ;;  %v518_v56 = vld [vmem:[%s1586_s11 + $0x968] sm:$0xff]  ;;  %v584_v57 = vld [vmem:[%s1586_s11 + $0xb78] sm:$0xff] }
  0xce   : > { %1058 = vmatpush1.msra.mxu1 %v551_v58  ;;  %990 = vmatprep.subr.mxu0 %v484_v59  ;;  %v517_v58 = vld [vmem:[%s1586_s11 + $0x960] sm:$0xff]  ;;  %v583_v59 = vld [vmem:[%s1586_s11 + $0xb70] sm:$0xff] }
  0xcf   : > { %1059 = vmatprep.subr.mxu1 %v550_v60  ;;  %991 = vmatpush1.msra.mxu0 %v483_v61  ;;  %v516_v60 = vld [vmem:[%s1586_s11 + $0x958] sm:$0xff]  ;;  %v582_v61 = vld [vmem:[%s1586_s11 + $0xb68] sm:$0xff] }
  0xd0   : > { %1060 = vmatpush1.msra.mxu1 %v549_v62  ;;  %992 = vmatprep.subr.mxu0 %v482_v63  ;;  %v515_v62 = vld [vmem:[%s1586_s11 + $0x950] sm:$0xff]  ;;  %v581_v63 = vld [vmem:[%s1586_s11 + $0xb60] sm:$0xff] }
  0xd1   : > { %1061 = vmatprep.subr.mxu1 %v548_v0  ;;  %993 = vmatpush1.msra.mxu0 %v481_v1  ;;  %v514_v0 = vld [vmem:[%s1586_s11 + $0x948] sm:$0xff]  ;;  %v580_v1 = vld [vmem:[%s1586_s11 + $0xb58] sm:$0xff] }
  0xd2   : > { %1062 = vmatpush1.msra.mxu1 %v547_v2  ;;  %994 = vmatprep.subr.mxu0 %v480_v3  ;;  %v215_v2 = vld [vmem:[%s2044_s0 + $0x10] sm:$0xff]  ;;  %v513_v3 = vld [vmem:[%s1586_s11 + $0x940] sm:$0xff] }
  0xd3   : > { %1063 = vmatprep.subr.mxu1 %v546_v4  ;;  %995 = vmatpush1.msra.mxu0 %v479_v5  ;;  %v579_v4 = vld [vmem:[%s1586_s11 + $0xb50] sm:$0xff]  ;;  %v512_v5 = vld [vmem:[%s1586_s11 + $0x938] sm:$0xff] }
  0xd4   : > { %1064 = vmatpush1.msra.mxu1 %v545_v6  ;;  %996 = vmatprep.subr.mxu0 %v478_v7  ;;  %v578_v6 = vld [vmem:[%s1586_s11 + $0xb48] sm:$0xff]  ;;  %v511_v7 = vld [vmem:[%s1586_s11 + $0x930] sm:$0xff] }
  0xd5   : > { %1065 = vmatprep.subr.mxu1 %v544_v8  ;;  %997 = vmatpush1.msra.mxu0 %v477_v9  ;;  %v577_v8 = vld [vmem:[%s1586_s11 + $0xb40] sm:$0xff]  ;;  %v647_v9 = vcombine.high %v215_v2, %v215_v2 }
  0xd6   : > { %1066 = vmatpush1.msra.mxu1 %v543_v10  ;;  %998 = vmatprep.subr.mxu0 %v476_v11  ;;  %v510_v10 = vld [vmem:[%s1586_s11 + $0x928] sm:$0xff]  ;;  %v576_v11 = vld [vmem:[%s1586_s11 + $0xb38] sm:$0xff] }
  0xd7   : > { %1067 = vmatprep.subr.mxu1 %v542_v12  ;;  %999 = vmatpush1.msra.mxu0 %v475_v13  ;;  %v654_v12 = vrot.slane %v215_v2, %v1705_v52  ;;  %v509_v13 = vld [vmem:[%s1586_s11 + $0x920] sm:$0xff] }
  0xd8   : > { %1068 = vmatpush1.msra.mxu1 %v541_v14  ;;  %1000 = vmatprep.subr.mxu0 %v474_v15  ;;  %v575_v14 = vld [vmem:[%s1586_s11 + $0xb30] sm:$0xff]  ;;  %v508_v15 = vld [vmem:[%s1586_s11 + $0x918] sm:$0xff] }
  0xd9   : > { %1069 = vmatprep.subr.mxu1 %v540_v16  ;;  %1001 = vmatpush1.msra.mxu0 %v473_v17  ;;  %v574_v16 = vld [vmem:[%s1586_s11 + $0xb28] sm:$0xff]  ;;  %v507_v17 = vld [vmem:[%s1586_s11 + $0x910] sm:$0xff] }
  0xda   : > { %1070 = vmatpush1.msra.mxu1 %v539_v18  ;;  %1002 = vmatprep.subr.mxu0 %v536_v19  ;;  %v573_v18 = vld [vmem:[%s1586_s11 + $0xb20] sm:$0xff]  ;;  %v661_v19 = vrot.slane %v647_v9, %v1705_v52 }
  0xdb   : > { %1071 = vmatprep.subr.mxu1 %v538_v20  ;;  %1003 = vmatpush2.msra.mxu0 %v535_v21  ;;  %v506_v20 = vld [vmem:[%s1586_s11 + $0x908] sm:$0xff]  ;;  %v572_v21 = vld [vmem:[%s1586_s11 + $0xb18] sm:$0xff] }
  0xdc   : > { %1072 = vmatpush1.msra.mxu1 %v537_v22  ;;  %1004 = vmatprep.subr.mxu0 %v534_v23  ;;  %v662_v22 = vcombine.high %v654_v12, %v654_v12  ;;  %v505_v23 = vld [vmem:[%s1586_s11 + $0x900] sm:$0xff] }
  0xdd   : > { %1073 = vmatprep.subr.mxu1 %v600_v24  ;;  %1005 = vmatpush2.msra.mxu0 %v533_v25  ;;  %v571_v24 = vld [vmem:[%s1586_s11 + $0xb10] sm:$0xff]  ;;  %v570_v25 = vld [vmem:[%s1586_s11 + $0xb08] sm:$0xff] }
  0xde   : > { %1074 = vmatpush2.msra.mxu1 %v599_v26  ;;  %1006 = vmatprep.subr.mxu0 %v532_v27  ;;  %v608_v26 = vld [vmem:[%s1586_s11 + $0xc38] sm:$0xff]  ;;  %v663_v27 = vcombine.high %v661_v19, %v661_v19 }
  0xdf   : > { %1075 = vmatprep.subr.mxu1 %v598_v28  ;;  %1007 = vmatpush2.msra.mxu0 %v531_v29  ;;  %v569_v28 = vld [vmem:[%s1586_s11 + $0xb00] sm:$0xff]  ;;  %v607_v29 = vld [vmem:[%s1586_s11 + $0xc30] sm:$0xff] }
  0xe0   : > { %1076 = vmatpush2.msra.mxu1 %v597_v30  ;;  %1008 = vmatprep.subr.mxu0 %v530_v31  ;;  %v606_v30 = vld [vmem:[%s1586_s11 + $0xc28] sm:$0xff]  ;;  %v605_v31 = vld [vmem:[%s1586_s11 + $0xc20] sm:$0xff] }
  0xe1   : > { %1077 = vmatprep.subr.mxu1 %v596_v32  ;;  %1009 = vmatpush2.msra.mxu0 %v529_v33  ;;  %v604_v32 = vld [vmem:[%s1586_s11 + $0xc18] sm:$0xff]  ;;  %v603_v33 = vld [vmem:[%s1586_s11 + $0xc10] sm:$0xff] }
  0xe2   : > { %1078 = vmatpush2.msra.mxu1 %v595_v34  ;;  %1010 = vmatprep.subr.mxu0 %v528_v35  ;;  %v1468_v34 = vmov 0.0   ;;  %v602_v35 = vld [vmem:[%s1586_s11 + $0xc08] sm:$0xff] }
  0xe3   : > { %1079 = vmatprep.subr.mxu1 %v594_v36  ;;  %1011 = vmatpush2.msra.mxu0 %v527_v37  ;;  %v601_v36 = vld [vmem:[%s1586_s11 + $0xc00] sm:$0xff]  ;;  %v1304_v37 = vld.sshfl [vmem:[%s2044_s0 + $0x18] sm:$0x3 pattern:$0x76325410]  ;;  %s1213_s11 = sshll.u32 %s204_s10, 4  ;;  %s1214_s11 = int_to_ptr.vmem [resolvable:$true] %s1213_s11 }
  0xe4   : > { %1080 = vmatpush2.msra.mxu1 %v593_v38  ;;  %1012 = vmatprep.subr.mxu0 %v526_v39  ;;  %s1397_s7 = scalar_lea.vmem %s1214_s11, 64  ;;  %p1404_p7 = scmp.lt.s32.totalorder %s1214_s11, %s1402_s19 }
  0xe5   : > { %1081 = vmatprep.subr.mxu1 %v592_v40  ;;  %1013 = vmatpush2.msra.mxu0 %v525_v41  ;;  %p1398_p11 = scmp.ne.s32.totalorder %s1214_s11, %s1397_s7  ;;  %p1405_p8 = scmp.lt.s32.totalorder %s1403_s16, %s1397_s7 }
  0xe6   : > { %1082 = vmatpush2.msra.mxu1 %v591_v42  ;;  %1014 = vmatprep.subr.mxu0 %v524_v43 }
  0xe7   : > { %1083 = vmatprep.subr.mxu1 %v590_v44  ;;  %1015 = vmatpush2.msra.mxu0 %v523_v45  ;;  %p1399_p4 = pnand %p1398_p11, %p2056_p12  ;;  %p1406_p9 = por %p1405_p8, %p1404_p7 }
  0xe8   : > { %1084 = vmatpush2.msra.mxu1 %v589_v46  ;;  %1016 = vmatprep.subr.mxu0 %v522_v47 }
  0xe9   : > { %1085 = vmatprep.subr.mxu1 %v588_v48  ;;  %1017 = vmatpush2.msra.mxu0 %v521_v49  ;;  %p1400_p5 = pneg %p1399_p4 }
  0xea   : > { %1086 = vmatpush2.msra.mxu1 %v587_v50  ;;  %1018 = vmatprep.subr.mxu0 %v520_v51 }
  0xeb   : > { %1087 = vmatprep.subr.mxu1 %v586_v53  ;;  %1019 = vmatpush2.msra.mxu0 %v519_v54  ;;  %p1407_p0 = pnand %p1406_p9, %p1400_p5 }
  0xec   : > { %1088 = vmatpush2.msra.mxu1 %v585_v55  ;;  %1020 = vmatprep.subr.mxu0 %v518_v56 }
  0xed   : > { %1089 = vmatprep.subr.mxu1 %v584_v57  ;;  %1021 = vmatpush2.msra.mxu0 %v517_v58 }
  0xee   : > { %1090 = vmatpush2.msra.mxu1 %v583_v59  ;;  %1022 = vmatprep.subr.mxu0 %v516_v60 }
  0xef   : > { %1091 = vmatprep.subr.mxu1 %v582_v61  ;;  %1023 = vmatpush2.msra.mxu0 %v515_v62 }
  0xf0   : > { %1092 = vmatpush2.msra.mxu1 %v581_v63  ;;  %1024 = vmatprep.subr.mxu0 %v514_v0  ;;  %v1183_v63 = vld [vmem:[%s209_s29] sm:$0xf] }
  0xf1   : > { %1093 = vmatprep.subr.mxu1 %v580_v1  ;;  %1025 = vmatpush2.msra.mxu0 %v513_v3  ;;  %v1184_v2 = vmul.f32 0.5, %v1183_v63 }
  0xf2   : > { %1094 = vmatpush2.msra.mxu1 %v579_v4  ;;  %1026 = vmatprep.subr.mxu0 %v512_v5 }
  0xf3   : > { %1095 = vmatprep.subr.mxu1 %v578_v6  ;;  %1027 = vmatpush2.msra.mxu0 %v511_v7 }
  0xf4   : > { %1096 = vmatpush2.msra.mxu1 %v577_v8  ;;  %1028 = vmatprep.subr.mxu0 %v510_v10 }
  0xf5   : > { %1097 = vmatprep.subr.mxu1 %v576_v11  ;;  %1029 = vmatpush2.msra.mxu0 %v509_v13 }
  0xf6   : > { %1098 = vmatpush2.msra.mxu1 %v575_v14  ;;  %1030 = vmatprep.subr.mxu0 %v508_v15 }
  0xf7   : > { %1099 = vmatprep.subr.mxu1 %v574_v16  ;;  %1031 = vmatpush2.msra.mxu0 %v507_v17 }
  0xf8   : > { %1100 = vmatpush2.msra.mxu1 %v573_v18  ;;  %1032 = vmatprep.subr.mxu0 %v506_v20 }
  0xf9   : > { %1101 = vmatprep.subr.mxu1 %v572_v21  ;;  %1033 = vmatpush2.msra.mxu0 %v505_v23 }
  0xfa   : > { %1034 = vmatprep.mubr.f32.mxu0 %v662_v22  ;;  %1102 = vmatpush2.msra.mxu1 %v571_v24 }
  0xfb   : > { %1035 = vmatmul.mubr.f32.vlgmr.msra.gmra.mxu0 %v654_v12  ;;  %1103 = vmatprep.subr.mxu1 %v570_v25 }
  0xfc   : > { %1136 = vmatprep.subr.mxu0 %v608_v26  ;;  %1104 = vmatpush2.msra.mxu1 %v569_v28 }
  0xfd   : > { %1105 = vmatprep.mubr.f32.mxu1 %v663_v27  ;;  %1137 = vmatpush1.msra.mxu0 %v607_v29 }
  0xfe   : > { %1106 = vmatmul.mubr.f32.vlgmr.msra.gmra.mxu1 %v661_v19  ;;  %1138 = vmatprep.subr.mxu0 %v606_v30 }
  0xff   : > { %1176 = vmatprep.mubr.f32.mxu0 %v1468_v34  ;;  %1139 = vmatpush1.msra.mxu0 %v605_v31 }
 0x100   : > { %1140 = vmatprep.subr.mxu0 %v604_v32 }
 0x101   : > { %1141 = vmatpush1.msra.mxu0 %v603_v33 }
 0x102   : > { %1142 = vmatprep.subr.mxu0 %v602_v35 }
 0x103   : > { %1143 = vmatpush1.msra.mxu0 %v601_v36 }
 0x104   : > { %1305 = vmatmul.mubr.msk.f32.vlgmr.msra.gmra.mxu0 %vm683_vm0, %v1304_v37 }
 0x138   : > { %v752_v38 = vpop.f32.mrf.mxu0 }
 0x139   : > { %v823_v39 = vpop.f32.mrf.mxu1 }
 0x13a   : > { %v754_v40 = vpop.f32.mrf.mxu0  ;;  %v824_v45 = vadd.f32 %v823_v39, %v752_v38 }
 0x13b   : > { %v825_v42 = vpop.f32.mrf.mxu1 }
 0x13c   : > { %v826_v46 = vadd.f32 %v825_v42, %v754_v40 }
 0x179   : > { %v894_v41 = vpop.f32.mrf.mxu0 }
 0x17a   : > { %v895_v48 = vadd.f32 %v894_v41, %v824_v45 }
 0x17b   : > { %v896_v43 = vpop.f32.mrf.mxu0 }
 0x17c   : > { %v965_v44 = vpop.f32.mrf.mxu1  ;;  %v897_v49 = vadd.f32 %v896_v43, %v826_v46 }
 0x17d   : > { %v966_v54 = vadd.f32 %v965_v44, %v895_v48 }
 0x17e   : > { %v967_v50 = vpop.f32.mrf.mxu1 }
 0x17f   : > { %v968_v55 = vadd.f32 %v967_v50, %v897_v49 }
 0x1bb   : > { %v1036_v47 = vpop.f32.mrf.mxu0 }
 0x1bc   : > { %v1037_v56 = vadd.f32 %v1036_v47, %v966_v54 }
 0x1bd   : > { %v1038_v51 = vpop.f32.mrf.mxu0 }
 0x1be   : > { %v1107_v53 = vpop.f32.mrf.mxu1  ;;  %v1039_v57 = vadd.f32 %v1038_v51, %v968_v55 }
 0x1bf   : > { %v1108_v60 = vadd.f32 %v1107_v53, %v1037_v56 }
 0x1c0   : > { %v1109_v58 = vpop.f32.mrf.mxu1 }
 0x1c1   : > { %v1110_v61 = vadd.f32 %v1109_v58, %v1039_v57 }
 0x1c4   : > { %v1178_v59 = vpop.f32.mrf.mxu0 }
 0x1c5   : > { %v1179_v0 = vadd.f32 %v1178_v59, %v1108_v60 }
 0x1c6   : > { %v1180_v62 = vpop.f32.mrf.mxu0 }
 0x1c7   : > { %v1181_v1 = vadd.f32 %v1180_v62, %v1110_v61 }
 0x1c9   : > { %v1187_v3 = vcombine.low %v1179_v0, %v1181_v1 }
 0x1cb   : > { %v1194_v4 = vrot.slane %v1187_v3, %v1705_v52 }
 0x1cd   : > { %v1196_v5 = vadd.f32 %v1194_v4, %v1184_v2 }
 0x1cf   : > { %1197 = vst [vmem:[%s204_s10] sm:$0xf] %v1196_v5 }
 0x1d0   : > { %1410 = shalt.err (!%p1407_p0)
}
 0x1d1   : > { %s1411_s20 = scalar_lea.hbm %s1211_s4, 64  ;;  %s1415_s26 = scalar_lea.hbm %s2047_s3, 256 }
 0x1d2   : > { %p1412_p2 = scmp.ne.s32.totalorder %s1211_s4, %s1411_s20  ;;  %p1416_p3 = scmp.lt.s32.totalorder %s1211_s4, %s2047_s3 }
 0x1d3   : > { %p1417_p6 = scmp.lt.s32.totalorder %s1415_s26, %s1411_s20 }
 0x1d4   : > { %p1413_p13 = pnand %p1412_p2, %p2056_p12 }
 0x1d5   : > { %p1418_p10 = por %p1417_p6, %p1416_p3 }
 0x1d6   : > { %p1414_p1 = pneg %p1413_p13 }
 0x1d8   : > { %p1419_p11 = pnand %p1418_p10, %p1414_p1 }
 0x1da   : > { %1422 = shalt.err (!%p1419_p11)
}
 0x1db   : > { %1317 = dma.vmem_to_hbm [thread:$0]  (%p2056_p12), %s1214_s11, 64, %s1211_s4, %s1199_s6  }
 0x1dc PF: > { %p1328_p4 = scmp.ge.s32.totalorder %s1461_s15, 2  ;;  %s1225_s29 = sand.u32 1, %s1449_s12  }
 0x1dd   : > { %p2057_p5 = scmp.ne.s32.totalorder %s2052_s24, 0  ;;  %s1226_s5 = scalar_lea.sflag [#allocation4], %s1225_s29 }
 0x1df   : > { %p1324_p7 = pnand %p1328_p4, %p2057_p5 }
 0x1e1   : > { %p1325_p8 = pneg %p1324_p7 }
 0x1e3   : > { %1444 = dma.done.wait (%p1325_p8), %s1226_s5, 64  }
 0x1e4   : > { %1446 = vsyncadd (%p1325_p8), %s1226_s5, 4294967232  ;;  %p16_p9 = scmp.ge.s32.totalorder %s1515_s18, 6   ;;  %s2058_s12 = smov %s1453_s13 }
 0x1e5   : > { %s2059_s13 = smov %s1457_s14  ;;  %s2060_s14 = smov %s1527_s21 }
 0x1e6   : > { %s2061_s15 = smov %s1515_s18  ;;  %18 = sbr.rel (!%p16_p9) target bundleno = 5 (0x5), region = 80 }
 0x1eb   :  { %1231 = vsyncpa [#allocation3], 1 }
 0x1ec   :  { %1233 = vsyncpa [#allocation3 + $0x1], 1 }
 0x1ed   :  { %1234 = vsyncpa [#allocation4], 1 }
 0x1ee   :  { %1236 = vsyncpa [#allocation4 + $0x1], 1 }

</bundles_post_ra>
